<compile_context>
chip_gen: v7x
topology: tpu7x:2x2x1
jax: 0.10.0
libtpu: 0.0.40
codegen_flags: <defaults>
</compile_context>

<pallas_src>
import functools

import numpy as np
import jax
import jax.numpy as jnp
from jax import lax
from jax.experimental import pallas as pl
from jax.experimental.pallas import tpu as pltpu

HIDDEN = 128  # torch hidden width is 100; zero-padded to a full 128 tile (exact math)


def _round_up(n, m):
    return ((n + m - 1) // m) * m


# ----------------------------- Pallas kernel --------------------------------
def _quant_kernel(t_ref, idx_ref, w1_ref, b1_ref, w2_ref, b2_ref,
                  w3_ref, b3_ref, out_ref, vals_ref, *, C, inv_bin, neg_slope):
    """One event tile: MLP for all C bins + a single MXU scatter matmul.

    Layouts:
      t_ref    (1, NE)           events on lanes
      idx_ref  (NE, 1)           bin-invariant spatial index, -1 for padded events
      w1,b1,b2 (HIDDEN, 1)       hidden on sublanes (column vectors)
      w2       (HIDDEN, HIDDEN)  torch (out, in) orientation
      w3       (1, HIDDEN), b3 (1, 1)
      out_ref  (CP, Vp)          resident accumulator: bins x voxel lanes
      vals_ref (CP, NE)          scratch: per-bin values for this event tile
    """
    @pl.when(pl.program_id(0) == 0)
    def _init():
        out_ref[...] = jnp.zeros_like(out_ref)
        vals_ref[...] = jnp.zeros_like(vals_ref)   # pad rows C..CP-1 stay zero

    t_row = t_ref[...]                             # (1, NE)
    w1 = w1_ref[...]
    b1 = b1_ref[...]
    w2 = w2_ref[...]
    b2 = b2_ref[...]
    w3 = w3_ref[...]
    b3 = b3_ref[...]

    # ValueLayer MLP, statically unrolled over the (small) number of bins.
    # TODO(synk): cast the MXU operands to bf16 on v6e/v7x once validated
    # against an equally-quantized reference (kept f32 here for exactness).
    for c in range(C):
        xin = t_row - (c * inv_bin)                # (1, NE)
        h = w1 * xin + b1                          # (HIDDEN, NE) VPU broadcast (K=1 layer)
        h = jnp.where(h > 0, h, neg_slope * h)     # LeakyReLU(0.1)
        h = jnp.dot(w2, h, preferred_element_type=jnp.float32) + b2   # MXU 128x128
        h = jnp.where(h > 0, h, neg_slope * h)
        v = jnp.dot(w3, h, preferred_element_type=jnp.float32) + b3   # (1, NE) MXU
        vals_ref[pl.ds(c, 1), :] = t_row * v       # values for bin c

    # Scatter-add for ALL bins at once as one MXU matmul contracting over the
    # event axis. The one-hot is bin-invariant and built once per event tile.
    # Padded events carry idx == -1 -> match no lane -> contribute zero.
    idx = idx_ref[...]                             # (NE, 1) int32
    ne = t_row.shape[1]
    vp = out_ref.shape[1]
    lane = lax.broadcasted_iota(jnp.int32, (ne, vp), 1)
    onehot = (lane == idx).astype(jnp.float32)     # (NE, Vp)
    out_ref[...] += jnp.dot(vals_ref[...], onehot,
                            preferred_element_type=jnp.float32)


# ------------------------------- glue ----------------------------------------
def _preprocess(events, dim, B):
    """Per-batch time normalization + bin-invariant spatial index (plain JAX)."""
    C, H, W = dim
    x, y, t, p, b = (events[:, i] for i in range(5))
    t_norm = t
    for bi in range(B):
        mask = b == bi
        tmax = jnp.max(jnp.where(mask, t, -jnp.inf))
        denom = jnp.where(tmax > 0, tmax, 1.0)     # guard empty batch / tmax == 0
        t_norm = jnp.where(mask, t_norm / denom, t_norm)
    p01 = (p + 1.0) / 2.0
    # Index into a (B, 2, H, W) spatial grid; the torch W*H*i_bin offset is
    # factored out and handled by the bin row of the kernel output.
    sp_idx = (x + W * y + H * W * (p01 + 2.0 * b)).astype(jnp.int32)
    return t_norm, sp_idx


def quantization_layer_forward(events, dim, params, *, event_tile=512):
    C, H, W = dim
    # TODO(synk): torch reads B via .item() on device data; kept host-side here
    # (forces a device sync and assumes events are sorted by batch id).
    B = int(np.asarray(events[-1, -1])) + 1
    t_norm, sp_idx = _preprocess(events, dim, B)

    N = events.shape[0]
    NE = min(event_tile, _round_up(N, 128))        # event tile size (grid axis)
    Np = _round_up(N, NE)
    Vsp = 2 * B * H * W                            # bin-invariant voxel lanes
    Vp = _round_up(Vsp, 128)
    CP = _round_up(max(C, 1), 8)

    # TODO(synk): for large 2*B*H*W the (NE, Vp) one-hot should also be tiled
    # along the voxel axis (and split "parallel" across v7x's two TensorCores);
    # not needed at these shapes.

    t_rows = jnp.zeros((1, Np), jnp.float32).at[0, :N].set(t_norm)
    idx_col = jnp.full((Np, 1), -1, jnp.int32).at[:N, 0].set(sp_idx)

    w1, b1, w2, b2, w3, b3 = params
    inv_bin = 0.0 if C == 1 else 1.0 / (C - 1)     # guard C == 1

    kern = functools.partial(_quant_kernel, C=C, inv_bin=inv_bin, neg_slope=0.1)

    def fixed(shape):
        return pl.BlockSpec(shape, lambda i: (0, 0))

    out = pl.pallas_call(
        kern,
        out_shape=jax.ShapeDtypeStruct((CP, Vp), jnp.float32),
        grid=(Np // NE,),
        in_specs=[
            pl.BlockSpec((1, NE), lambda i: (0, i)),       # t (lane-dense)
            pl.BlockSpec((NE, 1), lambda i: (i, 0)),       # spatial idx
            fixed((HIDDEN, 1)), fixed((HIDDEN, 1)),        # w1, b1
            fixed((HIDDEN, HIDDEN)), fixed((HIDDEN, 1)),   # w2, b2
            fixed((1, HIDDEN)), fixed((1, 1)),             # w3, b3
        ],
        out_specs=pl.BlockSpec((CP, Vp), lambda i: (0, 0)),
        scratch_shapes=[pltpu.VMEM((CP, NE), jnp.float32)],
        compiler_params=pltpu.CompilerParams(
            dimension_semantics=("arbitrary",),   # output resident across event tiles
            vmem_limit_bytes=32 * 1024 * 1024),
    )(t_rows, idx_col, w1, b1, w2, b2, w3, b3)

    # (C, 2*B*H*W) -> (B, 2, C, H, W) -> torch's cat([vox[:,0], vox[:,1]], dim=1)
    bins = out[:C, :Vsp].reshape(C, B, 2, H, W)
    vox = jnp.transpose(bins, (1, 2, 0, 3, 4))
    return jnp.concatenate([vox[:, 0], vox[:, 1]], axis=1)


def init_value_layer_params(key, mlp_layers=(1, 100, 100, 1)):
    # TODO(synk): trilinear_init.pth checkpoint / Adam pre-training in
    # ValueLayer.init_kernel not reproduced; deterministic random init instead.
    h = mlp_layers[1]
    k1, k2, k3, k4, k5, k6 = jax.random.split(key, 6)
    w1 = jax.random.uniform(k1, (h, 1), jnp.float32, -1.0, 1.0)   # Linear(1,h).weight
    b1 = jax.random.uniform(k2, (h, 1), jnp.float32, -1.0, 1.0)   # Linear(1,h).bias
    w2 = jax.random.uniform(k3, (h, h), jnp.float32, -0.1, 0.1)   # Linear(h,h).weight (out,in)
    b2 = jax.random.uniform(k4, (h, 1), jnp.float32, -0.1, 0.1)
    w3 = jax.random.uniform(k5, (1, h), jnp.float32, -0.1, 0.1)   # Linear(h,1).weight
    b3 = jax.random.uniform(k6, (1, 1), jnp.float32, -0.1, 0.1)

    def pad_h(a, axes):
        pads = [(0, 0)] * a.ndim
        for ax in axes:
            pads[ax] = (0, HIDDEN - a.shape[ax])
        return jnp.pad(a, pads)

    return (pad_h(w1, [0]), pad_h(b1, [0]), pad_h(w2, [0, 1]),
            pad_h(b2, [0]), pad_h(w3, [1]), b3)


# --------------------------- pure-JAX reference ------------------------------
def reference_forward(events, dim, params):
    C, H, W = dim
    B = int(np.asarray(events[-1, -1])) + 1
    t_norm, _ = _preprocess(events, dim, B)
    w1, b1, w2, b2, w3, b3 = params
    inv_bin = 0.0 if C == 1 else 1.0 / (C - 1)
    hi = lax.Precision.HIGHEST                     # keep the reference f32-exact

    def mlp(xin):                                  # xin (N,)
        h = xin[None, :] * w1 + b1                 # (HIDDEN, N)
        h = jnp.where(h > 0, h, 0.1 * h)
        h = jnp.dot(w2, h, precision=hi) + b2
        h = jnp.where(h > 0, h, 0.1 * h)
        return (jnp.dot(w3, h, precision=hi) + b3)[0]   # (N,)

    x, y, _, p, b = (events[:, i] for i in range(5))
    p01 = (p + 1.0) / 2.0
    idx_before = (x + W * y + W * H * C * p01 + W * H * C * 2 * b).astype(jnp.int32)

    vox = jnp.zeros((2 * C * H * W * B,), jnp.float32)
    for c in range(C):
        values = t_norm * mlp(t_norm - c * inv_bin)
        vox = vox.at[idx_before + W * H * c].add(values)
    vox = vox.reshape(B, 2, C, H, W)
    return jnp.concatenate([vox[:, 0], vox[:, 1]], axis=1)


# ------------------------------------------------------------------------------
if __name__ == "__main__":
    C, H, W = 4, 16, 16
    dim = (C, H, W)
    N = 100  # number of events
    B = 2

    key = jax.random.PRNGKey(0)
    kx, ky, kt, kp, kw = jax.random.split(key, 5)
    x = jax.random.randint(kx, (N,), 0, W).astype(jnp.float32)
    y = jax.random.randint(ky, (N,), 0, H).astype(jnp.float32)
    t = jax.random.uniform(kt, (N,), minval=0.05, maxval=1.0)
    p = (jax.random.randint(kp, (N,), 0, 2) * 2 - 1).astype(jnp.float32)
    b = jnp.concatenate(
        [jnp.zeros((N // 2,)), jnp.ones((N - N // 2,))]).astype(jnp.float32)
    events = jnp.stack([x, y, t, p, b], axis=1)    # (N, 5): [x, y, t, p, b]

    params = init_value_layer_params(kw)

    out = jax.block_until_ready(quantization_layer_forward(events, dim, params))
    assert out.shape == (B, 2 * C, H, W), out.shape

    ref = jax.block_until_ready(reference_forward(events, dim, params))
    np.testing.assert_allclose(np.asarray(out), np.asarray(ref),
                               rtol=1e-3, atol=1e-3)

    print("KERNEL_OK")
</pallas_src>

<mosaic_0001>
module attributes {stable_mosaic.version = 11 : i64} {
  func.func @_quant_kernel(%arg0: i32, %arg1: memref<1x128xf32, #tpu.memory_space<vmem>>, %arg2: memref<128x1xi32, #tpu.memory_space<vmem>>, %arg3: memref<128x1xf32, #tpu.memory_space<vmem>>, %arg4: memref<128x1xf32, #tpu.memory_space<vmem>>, %arg5: memref<128x128xf32, #tpu.memory_space<vmem>>, %arg6: memref<128x1xf32, #tpu.memory_space<vmem>>, %arg7: memref<1x128xf32, #tpu.memory_space<vmem>>, %arg8: memref<1x1xf32, #tpu.memory_space<vmem>>, %arg9: memref<8x1024xf32, #tpu.memory_space<vmem>>, %arg10: memref<8x128xf32, #tpu.memory_space<vmem>>) attributes {dimension_semantics = [#tpu.dimension_semantics<arbitrary>], iteration_bounds = array<i64: 1>, scalar_prefetch = 0 : i64, scratch_operands = 1 : i64, tpu.core_type = #tpu.core_type<tc>, window_params = [{transform_indices = @transform_0, window_bounds = array<i64: 1, 128>}, {transform_indices = @transform_1, window_bounds = array<i64: 128, 1>}, {pipeline_mode = #tpu.pipeline_mode<synchronous>, transform_indices = @transform_2, window_bounds = array<i64: 128, 1>}, {pipeline_mode = #tpu.pipeline_mode<synchronous>, transform_indices = @transform_3, window_bounds = array<i64: 128, 1>}, {pipeline_mode = #tpu.pipeline_mode<synchronous>, transform_indices = @transform_4, window_bounds = array<i64: 128, 128>}, {pipeline_mode = #tpu.pipeline_mode<synchronous>, transform_indices = @transform_5, window_bounds = array<i64: 128, 1>}, {pipeline_mode = #tpu.pipeline_mode<synchronous>, transform_indices = @transform_6, window_bounds = array<i64: 1, 128>}, {pipeline_mode = #tpu.pipeline_mode<synchronous>, transform_indices = @transform_7, window_bounds = array<i64: 1, 1>}, {pipeline_mode = #tpu.pipeline_mode<synchronous>, transform_indices = @transform_8, window_bounds = array<i64: 8, 1024>}]} {
    %c0_i32 = arith.constant 0 : i32
    %0 = arith.cmpi eq, %arg0, %c0_i32 : i32
    %1 = arith.extui %0 : i1 to i32
    %c0_i32_0 = arith.constant 0 : i32
    %2 = arith.cmpi ne, %1, %c0_i32_0 : i32
    scf.if %2 {
      %cst_55 = arith.constant 0.000000e+00 : f32
      %121 = vector.broadcast %cst_55 : f32 to vector<8x1024xf32>
      %c0_56 = arith.constant 0 : index
      %c0_57 = arith.constant 0 : index
      %122 = vector.load %arg9[%c0_56, %c0_57] : memref<8x1024xf32, #tpu.memory_space<vmem>>, vector<8x1024xf32>
      tpu.vector_store %arg9[%c0_56, %c0_57], %121 {strides = array<i32>} : memref<8x1024xf32, #tpu.memory_space<vmem>>, vector<8x1024xf32>,
      %cst_58 = arith.constant 0.000000e+00 : f32
      %123 = vector.broadcast %cst_58 : f32 to vector<8x128xf32>
      %c0_59 = arith.constant 0 : index
      %c0_60 = arith.constant 0 : index
      %124 = vector.load %arg10[%c0_59, %c0_60] : memref<8x128xf32, #tpu.memory_space<vmem>>, vector<8x128xf32>
      tpu.vector_store %arg10[%c0_59, %c0_60], %123 {strides = array<i32>} : memref<8x128xf32, #tpu.memory_space<vmem>>, vector<8x128xf32>,
    } else {
    }
    %c0 = arith.constant 0 : index
    %c0_1 = arith.constant 0 : index
    %3 = vector.load %arg1[%c0, %c0_1] : memref<1x128xf32, #tpu.memory_space<vmem>>, vector<1x128xf32>
    %c0_2 = arith.constant 0 : index
    %c0_3 = arith.constant 0 : index
    %4 = vector.load %arg3[%c0_2, %c0_3] : memref<128x1xf32, #tpu.memory_space<vmem>>, vector<128x1xf32>
    %c0_4 = arith.constant 0 : index
    %c0_5 = arith.constant 0 : index
    %5 = vector.load %arg4[%c0_4, %c0_5] : memref<128x1xf32, #tpu.memory_space<vmem>>, vector<128x1xf32>
    %c0_6 = arith.constant 0 : index
    %c0_7 = arith.constant 0 : index
    %6 = vector.load %arg5[%c0_6, %c0_7] : memref<128x128xf32, #tpu.memory_space<vmem>>, vector<128x128xf32>
    %c0_8 = arith.constant 0 : index
    %c0_9 = arith.constant 0 : index
    %7 = vector.load %arg6[%c0_8, %c0_9] : memref<128x1xf32, #tpu.memory_space<vmem>>, vector<128x1xf32>
    %c0_10 = arith.constant 0 : index
    %c0_11 = arith.constant 0 : index
    %8 = vector.load %arg7[%c0_10, %c0_11] : memref<1x128xf32, #tpu.memory_space<vmem>>, vector<1x128xf32>
    %c0_12 = arith.constant 0 : index
    %c0_13 = arith.constant 0 : index
    %9 = vector.load %arg8[%c0_12, %c0_13] : memref<1x1xf32, #tpu.memory_space<vmem>>, vector<1x1xf32>
    %cst = arith.constant 0.000000e+00 : f32
    %10 = vector.broadcast %cst : f32 to vector<1x128xf32>
    %11 = arith.subf %3, %10 : vector<1x128xf32>
    %12 = vector.broadcast %4 : vector<128x1xf32> to vector<128x128xf32>
    %13 = vector.broadcast %11 : vector<1x128xf32> to vector<128x128xf32>
    %14 = arith.mulf %12, %13 : vector<128x128xf32>
    %15 = vector.broadcast %5 : vector<128x1xf32> to vector<128x128xf32>
    %16 = arith.addf %14, %15 : vector<128x128xf32>
    %cst_14 = arith.constant 0.000000e+00 : f32
    %17 = vector.broadcast %cst_14 : f32 to vector<128x128xf32>
    %18 = arith.cmpf ogt, %16, %17 : vector<128x128xf32>
    %cst_15 = arith.constant 1.000000e-01 : f32
    %19 = vector.broadcast %cst_15 : f32 to vector<128x128xf32>
    %20 = arith.mulf %19, %16 : vector<128x128xf32>
    %21 = arith.select %18, %16, %20 : vector<128x128xi1>, vector<128x128xf32>
    %cst_16 = arith.constant dense<0.000000e+00> : vector<128x128xf32>
    %22 = tpu.matmul %6, %21, %cst_16 {dimension_numbers = #tpu.dot_dimension_numbers<[1], [0], [0], [1], [0, 0, 1, 1], [], []>} : vector<128x128xf32>, vector<128x128xf32>, vector<128x128xf32> -> vector<128x128xf32>
    %23 = vector.broadcast %7 : vector<128x1xf32> to vector<128x128xf32>
    %24 = arith.addf %22, %23 : vector<128x128xf32>
    %cst_17 = arith.constant 0.000000e+00 : f32
    %25 = vector.broadcast %cst_17 : f32 to vector<128x128xf32>
    %26 = arith.cmpf ogt, %24, %25 : vector<128x128xf32>
    %cst_18 = arith.constant 1.000000e-01 : f32
    %27 = vector.broadcast %cst_18 : f32 to vector<128x128xf32>
    %28 = arith.mulf %27, %24 : vector<128x128xf32>
    %29 = arith.select %26, %24, %28 : vector<128x128xi1>, vector<128x128xf32>
    %cst_19 = arith.constant dense<0.000000e+00> : vector<1x128xf32>
    %30 = tpu.matmul %8, %29, %cst_19 {dimension_numbers = #tpu.dot_dimension_numbers<[1], [0], [0], [1], [0, 0, 1, 1], [], []>} : vector<1x128xf32>, vector<128x128xf32>, vector<1x128xf32> -> vector<1x128xf32>
    %31 = vector.broadcast %9 : vector<1x1xf32> to vector<1x128xf32>
    %32 = arith.addf %30, %31 : vector<1x128xf32>
    %33 = arith.mulf %3, %32 : vector<1x128xf32>
    %c0_20 = arith.constant 0 : index
    %c0_21 = arith.constant 0 : index
    %34 = vector.load %arg10[%c0_20, %c0_21] : memref<8x128xf32, #tpu.memory_space<vmem>>, vector<1x128xf32>
    tpu.vector_store %arg10[%c0_20, %c0_21], %33 {strides = array<i32>} : memref<8x128xf32, #tpu.memory_space<vmem>>, vector<1x128xf32>,
    %cst_22 = arith.constant 0.333333343 : f32
    %35 = vector.broadcast %cst_22 : f32 to vector<1x128xf32>
    %36 = arith.subf %3, %35 : vector<1x128xf32>
    %37 = vector.broadcast %4 : vector<128x1xf32> to vector<128x128xf32>
    %38 = vector.broadcast %36 : vector<1x128xf32> to vector<128x128xf32>
    %39 = arith.mulf %37, %38 : vector<128x128xf32>
    %40 = vector.broadcast %5 : vector<128x1xf32> to vector<128x128xf32>
    %41 = arith.addf %39, %40 : vector<128x128xf32>
    %cst_23 = arith.constant 0.000000e+00 : f32
    %42 = vector.broadcast %cst_23 : f32 to vector<128x128xf32>
    %43 = arith.cmpf ogt, %41, %42 : vector<128x128xf32>
    %cst_24 = arith.constant 1.000000e-01 : f32
    %44 = vector.broadcast %cst_24 : f32 to vector<128x128xf32>
    %45 = arith.mulf %44, %41 : vector<128x128xf32>
    %46 = arith.select %43, %41, %45 : vector<128x128xi1>, vector<128x128xf32>
    %cst_25 = arith.constant dense<0.000000e+00> : vector<128x128xf32>
    %47 = tpu.matmul %6, %46, %cst_25 {dimension_numbers = #tpu.dot_dimension_numbers<[1], [0], [0], [1], [0, 0, 1, 1], [], []>} : vector<128x128xf32>, vector<128x128xf32>, vector<128x128xf32> -> vector<128x128xf32>
    %48 = vector.broadcast %7 : vector<128x1xf32> to vector<128x128xf32>
    %49 = arith.addf %47, %48 : vector<128x128xf32>
    %cst_26 = arith.constant 0.000000e+00 : f32
    %50 = vector.broadcast %cst_26 : f32 to vector<128x128xf32>
    %51 = arith.cmpf ogt, %49, %50 : vector<128x128xf32>
    %cst_27 = arith.constant 1.000000e-01 : f32
    %52 = vector.broadcast %cst_27 : f32 to vector<128x128xf32>
    %53 = arith.mulf %52, %49 : vector<128x128xf32>
    %54 = arith.select %51, %49, %53 : vector<128x128xi1>, vector<128x128xf32>
    %cst_28 = arith.constant dense<0.000000e+00> : vector<1x128xf32>
    %55 = tpu.matmul %8, %54, %cst_28 {dimension_numbers = #tpu.dot_dimension_numbers<[1], [0], [0], [1], [0, 0, 1, 1], [], []>} : vector<1x128xf32>, vector<128x128xf32>, vector<1x128xf32> -> vector<1x128xf32>
    %56 = vector.broadcast %9 : vector<1x1xf32> to vector<1x128xf32>
    %57 = arith.addf %55, %56 : vector<1x128xf32>
    %58 = arith.mulf %3, %57 : vector<1x128xf32>
    %c1 = arith.constant 1 : index
    %c0_29 = arith.constant 0 : index
    %59 = vector.load %arg10[%c1, %c0_29] : memref<8x128xf32, #tpu.memory_space<vmem>>, vector<1x128xf32>
    tpu.vector_store %arg10[%c1, %c0_29], %58 {strides = array<i32>} : memref<8x128xf32, #tpu.memory_space<vmem>>, vector<1x128xf32>,
    %cst_30 = arith.constant 0.666666686 : f32
    %60 = vector.broadcast %cst_30 : f32 to vector<1x128xf32>
    %61 = arith.subf %3, %60 : vector<1x128xf32>
    %62 = vector.broadcast %4 : vector<128x1xf32> to vector<128x128xf32>
    %63 = vector.broadcast %61 : vector<1x128xf32> to vector<128x128xf32>
    %64 = arith.mulf %62, %63 : vector<128x128xf32>
    %65 = vector.broadcast %5 : vector<128x1xf32> to vector<128x128xf32>
    %66 = arith.addf %64, %65 : vector<128x128xf32>
    %cst_31 = arith.constant 0.000000e+00 : f32
    %67 = vector.broadcast %cst_31 : f32 to vector<128x128xf32>
    %68 = arith.cmpf ogt, %66, %67 : vector<128x128xf32>
    %cst_32 = arith.constant 1.000000e-01 : f32
    %69 = vector.broadcast %cst_32 : f32 to vector<128x128xf32>
    %70 = arith.mulf %69, %66 : vector<128x128xf32>
    %71 = arith.select %68, %66, %70 : vector<128x128xi1>, vector<128x128xf32>
    %cst_33 = arith.constant dense<0.000000e+00> : vector<128x128xf32>
    %72 = tpu.matmul %6, %71, %cst_33 {dimension_numbers = #tpu.dot_dimension_numbers<[1], [0], [0], [1], [0, 0, 1, 1], [], []>} : vector<128x128xf32>, vector<128x128xf32>, vector<128x128xf32> -> vector<128x128xf32>
    %73 = vector.broadcast %7 : vector<128x1xf32> to vector<128x128xf32>
    %74 = arith.addf %72, %73 : vector<128x128xf32>
    %cst_34 = arith.constant 0.000000e+00 : f32
    %75 = vector.broadcast %cst_34 : f32 to vector<128x128xf32>
    %76 = arith.cmpf ogt, %74, %75 : vector<128x128xf32>
    %cst_35 = arith.constant 1.000000e-01 : f32
    %77 = vector.broadcast %cst_35 : f32 to vector<128x128xf32>
    %78 = arith.mulf %77, %74 : vector<128x128xf32>
    %79 = arith.select %76, %74, %78 : vector<128x128xi1>, vector<128x128xf32>
    %cst_36 = arith.constant dense<0.000000e+00> : vector<1x128xf32>
    %80 = tpu.matmul %8, %79, %cst_36 {dimension_numbers = #tpu.dot_dimension_numbers<[1], [0], [0], [1], [0, 0, 1, 1], [], []>} : vector<1x128xf32>, vector<128x128xf32>, vector<1x128xf32> -> vector<1x128xf32>
    %81 = vector.broadcast %9 : vector<1x1xf32> to vector<1x128xf32>
    %82 = arith.addf %80, %81 : vector<1x128xf32>
    %83 = arith.mulf %3, %82 : vector<1x128xf32>
    %c2 = arith.constant 2 : index
    %c0_37 = arith.constant 0 : index
    %84 = vector.load %arg10[%c2, %c0_37] : memref<8x128xf32, #tpu.memory_space<vmem>>, vector<1x128xf32>
    tpu.vector_store %arg10[%c2, %c0_37], %83 {strides = array<i32>} : memref<8x128xf32, #tpu.memory_space<vmem>>, vector<1x128xf32>,
    %cst_38 = arith.constant 1.000000e+00 : f32
    %85 = vector.broadcast %cst_38 : f32 to vector<1x128xf32>
    %86 = arith.subf %3, %85 : vector<1x128xf32>
    %87 = vector.broadcast %4 : vector<128x1xf32> to vector<128x128xf32>
    %88 = vector.broadcast %86 : vector<1x128xf32> to vector<128x128xf32>
    %89 = arith.mulf %87, %88 : vector<128x128xf32>
    %90 = vector.broadcast %5 : vector<128x1xf32> to vector<128x128xf32>
    %91 = arith.addf %89, %90 : vector<128x128xf32>
    %cst_39 = arith.constant 0.000000e+00 : f32
    %92 = vector.broadcast %cst_39 : f32 to vector<128x128xf32>
    %93 = arith.cmpf ogt, %91, %92 : vector<128x128xf32>
    %cst_40 = arith.constant 1.000000e-01 : f32
    %94 = vector.broadcast %cst_40 : f32 to vector<128x128xf32>
    %95 = arith.mulf %94, %91 : vector<128x128xf32>
    %96 = arith.select %93, %91, %95 : vector<128x128xi1>, vector<128x128xf32>
    %cst_41 = arith.constant dense<0.000000e+00> : vector<128x128xf32>
    %97 = tpu.matmul %6, %96, %cst_41 {dimension_numbers = #tpu.dot_dimension_numbers<[1], [0], [0], [1], [0, 0, 1, 1], [], []>} : vector<128x128xf32>, vector<128x128xf32>, vector<128x128xf32> -> vector<128x128xf32>
    %98 = vector.broadcast %7 : vector<128x1xf32> to vector<128x128xf32>
    %99 = arith.addf %97, %98 : vector<128x128xf32>
    %cst_42 = arith.constant 0.000000e+00 : f32
    %100 = vector.broadcast %cst_42 : f32 to vector<128x128xf32>
    %101 = arith.cmpf ogt, %99, %100 : vector<128x128xf32>
    %cst_43 = arith.constant 1.000000e-01 : f32
    %102 = vector.broadcast %cst_43 : f32 to vector<128x128xf32>
    %103 = arith.mulf %102, %99 : vector<128x128xf32>
    %104 = arith.select %101, %99, %103 : vector<128x128xi1>, vector<128x128xf32>
    %cst_44 = arith.constant dense<0.000000e+00> : vector<1x128xf32>
    %105 = tpu.matmul %8, %104, %cst_44 {dimension_numbers = #tpu.dot_dimension_numbers<[1], [0], [0], [1], [0, 0, 1, 1], [], []>} : vector<1x128xf32>, vector<128x128xf32>, vector<1x128xf32> -> vector<1x128xf32>
    %106 = vector.broadcast %9 : vector<1x1xf32> to vector<1x128xf32>
    %107 = arith.addf %105, %106 : vector<1x128xf32>
    %108 = arith.mulf %3, %107 : vector<1x128xf32>
    %c3 = arith.constant 3 : index
    %c0_45 = arith.constant 0 : index
    %109 = vector.load %arg10[%c3, %c0_45] : memref<8x128xf32, #tpu.memory_space<vmem>>, vector<1x128xf32>
    tpu.vector_store %arg10[%c3, %c0_45], %108 {strides = array<i32>} : memref<8x128xf32, #tpu.memory_space<vmem>>, vector<1x128xf32>,
    %c0_46 = arith.constant 0 : index
    %c0_47 = arith.constant 0 : index
    %110 = vector.load %arg2[%c0_46, %c0_47] : memref<128x1xi32, #tpu.memory_space<vmem>>, vector<128x1xi32>
    %111 = tpu.iota {dimensions = array<i32: 1>} : vector<128x1024xi32>
    %112 = vector.broadcast %110 : vector<128x1xi32> to vector<128x1024xi32>
    %113 = arith.cmpi eq, %111, %112 : vector<128x1024xi32>
    %114 = arith.extui %113 : vector<128x1024xi1> to vector<128x1024xi32>
    %115 = arith.sitofp %114 : vector<128x1024xi32> to vector<128x1024xf32>
    %c0_48 = arith.constant 0 : index
    %c0_49 = arith.constant 0 : index
    %116 = vector.load %arg9[%c0_48, %c0_49] : memref<8x1024xf32, #tpu.memory_space<vmem>>, vector<8x1024xf32>
    %c0_50 = arith.constant 0 : index
    %c0_51 = arith.constant 0 : index
    %117 = vector.load %arg10[%c0_50, %c0_51] : memref<8x128xf32, #tpu.memory_space<vmem>>, vector<8x128xf32>
    %cst_52 = arith.constant dense<0.000000e+00> : vector<8x1024xf32>
    %118 = tpu.matmul %117, %115, %cst_52 {dimension_numbers = #tpu.dot_dimension_numbers<[1], [0], [0], [1], [0, 0, 1, 1], [], []>} : vector<8x128xf32>, vector<128x1024xf32>, vector<8x1024xf32> -> vector<8x1024xf32>
    %119 = arith.addf %116, %118 : vector<8x1024xf32>
    %c0_53 = arith.constant 0 : index
    %c0_54 = arith.constant 0 : index
    %120 = vector.load %arg9[%c0_53, %c0_54] : memref<8x1024xf32, #tpu.memory_space<vmem>>, vector<8x1024xf32>
    tpu.vector_store %arg9[%c0_53, %c0_54], %119 {strides = array<i32>} : memref<8x1024xf32, #tpu.memory_space<vmem>>, vector<8x1024xf32>,
    return
  }
  func.func @transform_0(%arg0: i32) -> (i32, i32) {
    %c0_i32 = arith.constant 0 : i32
    %c0_i32_0 = arith.constant 0 : i32
    return %c0_i32, %arg0 : i32, i32
  }
  func.func @transform_1(%arg0: i32) -> (i32, i32) {
    %c0_i32 = arith.constant 0 : i32
    %c0_i32_0 = arith.constant 0 : i32
    return %arg0, %c0_i32 : i32, i32
  }
  func.func @transform_2(%arg0: i32) -> (i32, i32) {
    %c0_i32 = arith.constant 0 : i32
    %c0_i32_0 = arith.constant 0 : i32
    %c0_i32_1 = arith.constant 0 : i32
    return %c0_i32, %c0_i32_0 : i32, i32
  }
  func.func @transform_3(%arg0: i32) -> (i32, i32) {
    %c0_i32 = arith.constant 0 : i32
    %c0_i32_0 = arith.constant 0 : i32
    %c0_i32_1 = arith.constant 0 : i32
    return %c0_i32, %c0_i32_0 : i32, i32
  }
  func.func @transform_4(%arg0: i32) -> (i32, i32) {
    %c0_i32 = arith.constant 0 : i32
    %c0_i32_0 = arith.constant 0 : i32
    %c0_i32_1 = arith.constant 0 : i32
    return %c0_i32, %c0_i32_0 : i32, i32
  }
  func.func @transform_5(%arg0: i32) -> (i32, i32) {
    %c0_i32 = arith.constant 0 : i32
    %c0_i32_0 = arith.constant 0 : i32
    %c0_i32_1 = arith.constant 0 : i32
    return %c0_i32, %c0_i32_0 : i32, i32
  }
  func.func @transform_6(%arg0: i32) -> (i32, i32) {
    %c0_i32 = arith.constant 0 : i32
    %c0_i32_0 = arith.constant 0 : i32
    %c0_i32_1 = arith.constant 0 : i32
    return %c0_i32, %c0_i32_0 : i32, i32
  }
  func.func @transform_7(%arg0: i32) -> (i32, i32) {
    %c0_i32 = arith.constant 0 : i32
    %c0_i32_0 = arith.constant 0 : i32
    %c0_i32_1 = arith.constant 0 : i32
    return %c0_i32, %c0_i32_0 : i32, i32
  }
  func.func @transform_8(%arg0: i32) -> (i32, i32) {
    %c0_i32 = arith.constant 0 : i32
    %c0_i32_0 = arith.constant 0 : i32
    %c0_i32_1 = arith.constant 0 : i32
    return %c0_i32, %c0_i32_0 : i32, i32
  }
}

</mosaic_0001>

<bundles_post_ra>
// kernel: tpu_custom_call.1
= control target key start
LH: loop header
LB: loop body
LE: loop exit
PB: predicated region body
PF: predicated region fallthrough
CT: control target
= control target key end

     0   :  { %s5658_s0 = inlined_call_operand.vmem [shape: f32[1,128], index: 0, kind: input, shape index: {}]   ;;  %s5659_s1 = inlined_call_operand.vmem [shape: s32[128,1], index: 1, kind: input, shape index: {}]   ;;  %s5660_s2 = inlined_call_operand.vmem [shape: f32[128,1], index: 2, kind: input, shape index: {}]   ;;  %s5661_s3 = inlined_call_operand.vmem [shape: f32[128,1], index: 3, kind: input, shape index: {}]   ;;  %s5662_s4 = inlined_call_operand.vmem [shape: f32[128,128], index: 4, kind: input, shape index: {}]   ;;  %s5663_s5 = inlined_call_operand.vmem [shape: f32[128,1], index: 5, kind: input, shape index: {}]   ;;  %s5664_s6 = inlined_call_operand.vmem [shape: f32[1,128], index: 6, kind: input, shape index: {}]   ;;  %s5665_s7 = inlined_call_operand.<no memory space> [shape: f32[1,1], index: 7, kind: input, shape index: {}]   ;;  %s5666_s8 = inlined_call_operand.hbm [shape: f32[8,1024], index: 8, kind: output, shape index: {}]  }
   0x1   :  { %v13_v0 = vstv %s5665_s7 }
   0x2   :  { %14 = vst [vmem:[#allocation3] sm:$0x1] %v13_v0 }
   0x3   :  { %v62_v1 = vld [vmem:[%s5661_s3] sm:$0xff]  ;;  %v3753_v3 = vmov 0   ;;  %v63_v4 = vld [vmem:[%s5661_s3 + $0x8] sm:$0xff]  ;;  %v49_v6 = vld [vmem:[%s5660_s2 + $0x18] sm:$0xff] }
   0x4   :  { %v46_v2 = vld [vmem:[%s5660_s2] sm:$0xff]  ;;  %3726 = vset.pattern.permute.xlu1 %v3753_v3  ;;  %3725 = vset.pattern.permute.xlu0 %v3753_v3  ;;  %v47_v5 = vld [vmem:[%s5660_s2 + $0x8] sm:$0xff]  ;;  %v48_v7 = vld [vmem:[%s5660_s2 + $0x10] sm:$0xff] }
   0x5   :  { %216 = vperm.xlu1 %3726, %v62_v1   ;;  %114 = vperm.xlu0 %3725, %v46_v2   ;;  %v65_v8 = vld [vmem:[%s5661_s3 + $0x18] sm:$0xff]  ;;  %v64_v9 = vld [vmem:[%s5661_s3 + $0x10] sm:$0xff]  ;;  %v51_v10 = vld [vmem:[%s5660_s2 + $0x28] sm:$0xff] }
   0x6   :  { %v50_v11 = vld [vmem:[%s5660_s2 + $0x20] sm:$0xff]  ;;  %v67_v12 = vld [vmem:[%s5661_s3 + $0x28] sm:$0xff]  ;;  %v53_v14 = vld [vmem:[%s5660_s2 + $0x38] sm:$0xff] }
   0x7   :  { %v66_v13 = vld [vmem:[%s5661_s3 + $0x20] sm:$0xff]  ;;  %v52_v15 = vld [vmem:[%s5660_s2 + $0x30] sm:$0xff] }
   0x9   :  { %221 = vperm.xlu1 %3726, %v63_v4   ;;  %119 = vperm.xlu0 %3725, %v47_v5  }
   0xd   :  { %129 = vperm.xlu1 %3726, %v49_v6   ;;  %124 = vperm.xlu0 %3725, %v48_v7  }
  0x11   :  { %231 = vperm.xlu1 %3726, %v65_v8   ;;  %226 = vperm.xlu0 %3725, %v64_v9  }
  0x15   :  { %139 = vperm.xlu1 %3726, %v51_v10   ;;  %134 = vperm.xlu0 %3725, %v50_v11  }
  0x19   :  { %241 = vperm.xlu1 %3726, %v67_v12   ;;  %236 = vperm.xlu0 %3725, %v66_v13  }
  0x1a   :  { %15 = vsyncpa [#allocation5], 0  ;;  %v69_v16 = vld [vmem:[%s5661_s3 + $0x38] sm:$0xff]  ;;  %v68_v17 = vld [vmem:[%s5661_s3 + $0x30] sm:$0xff]  ;;  %v193_v61 = vlaneseq }
  0x1b   :  { %v55_v18 = vld [vmem:[%s5660_s2 + $0x48] sm:$0xff]  ;;  %v54_v19 = vld [vmem:[%s5660_s2 + $0x40] sm:$0xff]  ;;  %v57_v22 = vld [vmem:[%s5660_s2 + $0x58] sm:$0xff] }
  0x1c   :  { %v71_v20 = vld [vmem:[%s5661_s3 + $0x48] sm:$0xff]  ;;  %v70_v21 = vld [vmem:[%s5661_s3 + $0x40] sm:$0xff]  ;;  %v56_v23 = vld [vmem:[%s5660_s2 + $0x50] sm:$0xff]  ;;  %v194_v0 = vshrl.u32 %v193_v61, 7 }
  0x1d   :  { %149 = vperm.xlu1 %3726, %v53_v14   ;;  %144 = vperm.xlu0 %3725, %v52_v15   ;;  %v73_v24 = vld [vmem:[%s5661_s3 + $0x58] sm:$0xff]  ;;  %v72_v25 = vld [vmem:[%s5661_s3 + $0x50] sm:$0xff]  ;;  %v59_v26 = vld [vmem:[%s5660_s2 + $0x68] sm:$0xff] }
  0x1e   :  { %v58_v27 = vld [vmem:[%s5660_s2 + $0x60] sm:$0xff]  ;;  %v75_v28 = vld [vmem:[%s5661_s3 + $0x68] sm:$0xff]  ;;  %v61_v30 = vld [vmem:[%s5660_s2 + $0x78] sm:$0xff]  ;;  %v3996_v4 = vsub.s32 0, %v194_v0 }
  0x1f   :  { %v74_v29 = vld [vmem:[%s5661_s3 + $0x60] sm:$0xff]  ;;  %v60_v31 = vld [vmem:[%s5660_s2 + $0x70] sm:$0xff]  ;;  %v77_v32 = vld [vmem:[%s5661_s3 + $0x78] sm:$0xff] }
  0x20   :  { %v76_v33 = vld [vmem:[%s5661_s3 + $0x70] sm:$0xff]  ;;  %v95_v34 = vld [vmem:[%s5663_s5 + $0x8] sm:$0xff]  ;;  %v94_v35 = vld [vmem:[%s5663_s5] sm:$0xff]  ;;  %5706 = vst [vmem:[#allocation7_spill] sm:$0xff] %v3996_v4 }
  0x21   :  { %251 = vperm.xlu1 %3726, %v69_v16   ;;  %246 = vperm.xlu0 %3725, %v68_v17   ;;  %v97_v36 = vld [vmem:[%s5663_s5 + $0x18] sm:$0xff]  ;;  %v96_v37 = vld [vmem:[%s5663_s5 + $0x10] sm:$0xff]  ;;  %v99_v38 = vld [vmem:[%s5663_s5 + $0x28] sm:$0xff] }
  0x22   :  { %v98_v39 = vld [vmem:[%s5663_s5 + $0x20] sm:$0xff]  ;;  %v101_v41 = vld [vmem:[%s5663_s5 + $0x38] sm:$0xff]  ;;  %v100_v42 = vld [vmem:[%s5663_s5 + $0x30] sm:$0xff] }
  0x23   :  { %v78_v40 = vld [vmem:[%s5662_s4] sm:$0xff]  ;;  %v103_v43 = vld [vmem:[%s5663_s5 + $0x48] sm:$0xff]  ;;  %v105_v45 = vld [vmem:[%s5663_s5 + $0x58] sm:$0xff] }
  0x24   :  { %3035 = vmatprep.mubr.f32.mxu0 %v78_v40  ;;  %v102_v44 = vld [vmem:[%s5663_s5 + $0x40] sm:$0xff]  ;;  %v104_v46 = vld [vmem:[%s5663_s5 + $0x50] sm:$0xff]  ;;  %v107_v47 = vld [vmem:[%s5663_s5 + $0x68] sm:$0xff] }
  0x25   :  { %159 = vperm.xlu1 %3726, %v55_v18   ;;  %154 = vperm.xlu0 %3725, %v54_v19   ;;  %v106_v48 = vld [vmem:[%s5663_s5 + $0x60] sm:$0xff]  ;;  %v109_v49 = vld [vmem:[%s5663_s5 + $0x78] sm:$0xff]  ;;  %v108_v50 = vld [vmem:[%s5663_s5 + $0x70] sm:$0xff] }
  0x26   :  { %v1769_v51 = vld [vmem:[%s5659_s1 + $0x8] sm:$0xff]  ;;  %v1768_v52 = vld [vmem:[%s5659_s1] sm:$0xff]  ;;  %v1771_v53 = vld [vmem:[%s5659_s1 + $0x18] sm:$0xff] }
  0x27   :  { %v1770_v54 = vld [vmem:[%s5659_s1 + $0x10] sm:$0xff]  ;;  %v1773_v55 = vld [vmem:[%s5659_s1 + $0x28] sm:$0xff]  ;;  %v1772_v56 = vld [vmem:[%s5659_s1 + $0x20] sm:$0xff] }
  0x28   :  { %v1775_v57 = vld [vmem:[%s5659_s1 + $0x38] sm:$0xff]  ;;  %v1774_v58 = vld [vmem:[%s5659_s1 + $0x30] sm:$0xff]  ;;  %v1777_v59 = vld [vmem:[%s5659_s1 + $0x48] sm:$0xff] }
  0x29   :  { %261 = vperm.xlu1 %3726, %v71_v20   ;;  %256 = vperm.xlu0 %3725, %v70_v21   ;;  %v1776_v60 = vld [vmem:[%s5659_s1 + $0x40] sm:$0xff]  ;;  %v1779_v62 = vld [vmem:[%s5659_s1 + $0x58] sm:$0xff]  ;;  %v1778_v63 = vld [vmem:[%s5659_s1 + $0x50] sm:$0xff] }
  0x2a   :  { %v1780_v1 = vld [vmem:[%s5659_s1 + $0x60] sm:$0xff]  ;;  %v111_v2 = vld [vmem:[#allocation3] sm:$0x1]  ;;  %v1782_v7 = vld [vmem:[%s5659_s1 + $0x70] sm:$0xff] }
  0x2b   :  { %v45_v3 = vld [vmem:[%s5658_s0] sm:$0x1]  ;;  %v1781_v8 = vld [vmem:[%s5659_s1 + $0x68] sm:$0xff]  ;;  %v1783_v14 = vld [vmem:[%s5659_s1 + $0x78] sm:$0xff] }
  0x2c   :  { %v2549_v5 = vadd.f32 -0.6666667, %v45_v3  ;;  %v2550_v6 = vadd.f32 -1.0, %v45_v3  ;;  %v2548_v9 = vadd.f32 -0.33333334, %v45_v3  ;;  %v4011_v12 = vrot.slane %v45_v3, %v3996_v4 }
  0x2d   :  { %169 = vperm.xlu1 %3726, %v57_v22   ;;  %164 = vperm.xlu0 %3725, %v56_v23  }
  0x2e   :  { %v4005_v10 = vrot.slane %v2549_v5, %v3996_v4  ;;  %v4008_v11 = vrot.slane %v2550_v6, %v3996_v4  ;;  %v4014_v13 = vrot.slane %v2548_v9, %v3996_v4 }
  0x31   :  { %271 = vperm.xlu1 %3726, %v73_v24   ;;  %266 = vperm.xlu0 %3725, %v72_v25  }
  0x35   :  { %179 = vperm.xlu1 %3726, %v59_v26   ;;  %174 = vperm.xlu0 %3725, %v58_v27  }
  0x39   :  { %281 = vperm.xlu1 %3726, %v75_v28   ;;  %276 = vperm.xlu0 %3725, %v74_v29  }
  0x3d   :  { %189 = vperm.xlu1 %3726, %v61_v30   ;;  %184 = vperm.xlu0 %3725, %v60_v31  }
  0x41   :  { %291 = vperm.xlu1 %3726, %v77_v32   ;;  %286 = vperm.xlu0 %3725, %v76_v33  }
  0x45   :  { %365 = vperm.xlu1 %3726, %v95_v34   ;;  %360 = vperm.xlu0 %3725, %v94_v35   ;;  %v4034_v35 = vand.u32 127, %v193_v61 }
  0x49   :  { %375 = vperm.xlu1 %3726, %v97_v36   ;;  %370 = vperm.xlu0 %3725, %v96_v37  }
  0x4d   :  { %385 = vperm.xlu1 %3726, %v99_v38   ;;  %380 = vperm.xlu0 %3725, %v98_v39  }
  0x51   :  { %395 = vperm.xlu1 %3726, %v101_v41   ;;  %390 = vperm.xlu0 %3725, %v100_v42  }
  0x55   :  { %405 = vperm.xlu1 %3726, %v103_v43   ;;  %400 = vperm.xlu0 %3725, %v102_v44  }
  0x59   :  { %415 = vperm.xlu1 %3726, %v105_v45   ;;  %410 = vperm.xlu0 %3725, %v104_v46  }
  0x5d   :  { %425 = vperm.xlu1 %3726, %v107_v47   ;;  %420 = vperm.xlu0 %3725, %v106_v48  }
  0x61   :  { %435 = vperm.xlu1 %3726, %v109_v49   ;;  %430 = vperm.xlu0 %3725, %v108_v50  }
  0x65   :  { %1797 = vperm.xlu1 %3726, %v1769_v51   ;;  %1794 = vperm.xlu0 %3725, %v1768_v52  }
  0x69   :  { %1803 = vperm.xlu1 %3726, %v1771_v53   ;;  %1800 = vperm.xlu0 %3725, %v1770_v54  }
  0x6d   :  { %1809 = vperm.xlu1 %3726, %v1773_v55   ;;  %1806 = vperm.xlu0 %3725, %v1772_v56  }
  0x71   :  { %1815 = vperm.xlu1 %3726, %v1775_v57   ;;  %1812 = vperm.xlu0 %3725, %v1774_v58  }
  0x75   :  { %1821 = vperm.xlu1 %3726, %v1777_v59   ;;  %1818 = vperm.xlu0 %3725, %v1776_v60  }
  0x79   :  { %1827 = vperm.xlu1 %3726, %v1779_v62   ;;  %1824 = vperm.xlu0 %3725, %v1778_v63  }
  0x7d   :  { %1830 = vperm.xlu1 %3726, %v1780_v1   ;;  %633 = vperm.xlu0 %3725, %v111_v2  }
  0x81   :  { %1836 = vperm.xlu1 %3726, %v1782_v7   ;;  %1833 = vperm.xlu0 %3725, %v1781_v8  }
  0x84   :  { %v217_v15 = vpop.permute.xlu1 %216  ;;  %v115_v16 = vpop.permute.xlu0 %114 }
  0x85   :  { %v1071_v17 = vmul.f32 %v4005_v10, %v115_v16  ;;  %v1423_v18 = vmul.f32 %v4008_v11, %v115_v16  ;;  %1839 = vperm.xlu0 %3725, %v1783_v14   ;;  %v198_v19 = vmul.f32 %v4011_v12, %v115_v16  ;;  %v719_v20 = vmul.f32 %v4014_v13, %v115_v16 }
  0x87   :  { %v4023_v21 = vadd.f32 %v1071_v17, %v217_v15  ;;  %v4025_v22 = vadd.f32 %v1423_v18, %v217_v15  ;;  %v735_v28 = vadd.f32 %v719_v20, %v217_v15  ;;  %v294_v29 = vadd.f32 %v217_v15, %v198_v19 }
  0x88   :  { %v222_v23 = vpop.permute.xlu1 %221  ;;  %v120_v24 = vpop.permute.xlu0 %119 }
  0x89   :  { %v199_v25 = vmul.f32 %v4011_v12, %v120_v24  ;;  %v1072_v26 = vmul.f32 %v4005_v10, %v120_v24  ;;  %v1424_v27 = vmul.f32 %v4008_v11, %v120_v24  ;;  %v720_v36 = vmul.f32 %v4014_v13, %v120_v24 }
  0x8a   :  { %vm310_vm0 = vcmp.gt.f32.partialorder %v294_v29, 0.0  ;;  %v326_v37 = vmul.f32 0.1, %v294_v29  ;;  %vm751_vm1 = vcmp.gt.f32.partialorder %v735_v28, 0.0  ;;  %v767_v50 = vmul.f32 0.1, %v735_v28 }
  0x8b   :  { %v4030_v30 = vadd.f32 %v1072_v26, %v222_v23  ;;  %v4032_v31 = vadd.f32 %v1424_v27, %v222_v23  ;;  %v295_v32 = vadd.f32 %v222_v23, %v199_v25  ;;  %v4047_v51 = vadd.f32 %v720_v36, %v222_v23 }
  0x8c   :  { %v130_v33 = vpop.permute.xlu1 %129  ;;  %v125_v34 = vpop.permute.xlu0 %124  ;;  %v342_v56 = vsel %vm310_vm0, %v294_v29, %v326_v37  ;;  %v4057_v0 = vsel %vm751_vm1, %v735_v28, %v767_v50  ;;  %vm1103_vm5 = vcmp.gt.f32.partialorder %v4023_v21, 0.0  ;;  %v1119_v1 = vmul.f32 0.1, %v4023_v21 }
  0x8d   :  { %v201_v38 = vmul.f32 %v4011_v12, %v130_v33  ;;  %v1074_v39 = vmul.f32 %v4005_v10, %v130_v33  ;;  %v1426_v40 = vmul.f32 %v4008_v11, %v130_v33  ;;  %v327_v41 = vmul.f32 0.1, %v295_v32 }
  0x8e   :  { %v200_v42 = vmul.f32 %v4011_v12, %v125_v34  ;;  %v1073_v43 = vmul.f32 %v4005_v10, %v125_v34  ;;  %v1425_v44 = vmul.f32 %v4008_v11, %v125_v34  ;;  %vm311_vm2 = vcmp.gt.f32.partialorder %v295_v32, 0.0 }
  0x8f   :  { %v721_v55 = vmul.f32 %v4014_v13, %v125_v34  ;;  %v343_v57 = vsel %vm311_vm2, %v295_v32, %v327_v41  ;;  %v722_v63 = vmul.f32 %v4014_v13, %v130_v33  ;;  %v4065_v5 = vmul.f32 0.1, %v4047_v51 }
  0x90   :  { %v232_v45 = vpop.permute.xlu1 %231  ;;  %v227_v46 = vpop.permute.xlu0 %226  ;;  %v3367_v59 = vpack.c.bf16 %v343_v57, %v342_v56  ;;  %v1120_v6 = vmul.f32 0.1, %v4030_v30  ;;  %vm752_vm6 = vcmp.gt.f32.partialorder %v4047_v51, 0.0  ;;  %vm1104_vm7 = vcmp.gt.f32.partialorder %v4030_v30, 0.0 }
  0x91   :  { %v297_v47 = vadd.f32 %v232_v45, %v201_v38  ;;  %v4043_v48 = vadd.f32 %v1074_v39, %v232_v45  ;;  %v4045_v49 = vadd.f32 %v1426_v40, %v232_v45  ;;  %v296_v52 = vadd.f32 %v227_v46, %v200_v42 }
  0x92   :  { %v4049_v53 = vadd.f32 %v1073_v43, %v227_v46  ;;  %v4051_v54 = vadd.f32 %v1425_v44, %v227_v46  ;;  %v4061_v2 = vadd.f32 %v721_v55, %v227_v46  ;;  %3368 = vmatprep.subr.bf16.mxu0 %v3367_v59  ;;  %v4073_v23 = vadd.f32 %v722_v63, %v232_v45 }
  0x93   :  { %v329_v58 = vmul.f32 0.1, %v297_v47  ;;  %vm312_vm3 = vcmp.gt.f32.partialorder %v296_v52, 0.0  ;;  %vm313_vm4 = vcmp.gt.f32.partialorder %v297_v47, 0.0  ;;  %v328_v62 = vmul.f32 0.1, %v296_v52  ;;  %3370 = vmatpush3.bf16.msra.mxu0 %v3367_v59 }
  0x94   :  { %v140_v60 = vpop.permute.xlu1 %139  ;;  %v135_v61 = vpop.permute.xlu0 %134  ;;  %v1135_v36 = vsel %vm1103_vm5, %v4023_v21, %v1119_v1  ;;  %vm753_vm10 = vcmp.gt.f32.partialorder %v4061_v2, 0.0  ;;  %vm754_vm11 = vcmp.gt.f32.partialorder %v4073_v23, 0.0  ;;  %v769_v41 = vmul.f32 0.1, %v4061_v2 }
  0x95   :  { %v203_v3 = vmul.f32 %v4011_v12, %v140_v60  ;;  %v1076_v7 = vmul.f32 %v4005_v10, %v140_v60  ;;  %v1428_v8 = vmul.f32 %v4008_v11, %v140_v60  ;;  %v344_v9 = vsel %vm312_vm3, %v296_v52, %v328_v62 }
  0x96   :  { %v345_v14 = vsel %vm313_vm4, %v297_v47, %v329_v58  ;;  %v202_v15 = vmul.f32 %v4011_v12, %v135_v61  ;;  %v1075_v16 = vmul.f32 %v4005_v10, %v135_v61  ;;  %v1427_v17 = vmul.f32 %v4008_v11, %v135_v61 }
  0x97   :  { %v3371_v20 = vpack.c.bf16 %v345_v14, %v344_v9  ;;  %v724_v32 = vmul.f32 %v4014_v13, %v140_v60  ;;  %v723_v33 = vmul.f32 %v4014_v13, %v135_v61  ;;  %v1136_v42 = vsel %vm1104_vm7, %v4030_v30, %v1120_v6 }
  0x98   :  { %v242_v18 = vpop.permute.xlu1 %241  ;;  %v237_v19 = vpop.permute.xlu0 %236  ;;  %v770_v21 = vmul.f32 0.1, %v4073_v23  ;;  %v4101_v59 = vpack.c.bf16 %v1136_v42, %v1135_v36  ;;  %vm1105_vm4 = vcmp.gt.f32.partialorder %v4049_v53, 0.0  ;;  %vm1106_vm5 = vcmp.gt.f32.partialorder %v4043_v48, 0.0 }
  0x99   :  { %v299_v24 = vadd.f32 %v242_v18, %v203_v3  ;;  %v4075_v25 = vadd.f32 %v1076_v7, %v242_v18  ;;  %v4077_v26 = vadd.f32 %v1428_v8, %v242_v18  ;;  %v298_v27 = vadd.f32 %v237_v19, %v202_v15  ;;  %3372 = vmatprep.subr.bf16.mxu0 %v3371_v20 }
  0x9a   :  { %v4079_v28 = vadd.f32 %v1075_v16, %v237_v19  ;;  %v4081_v29 = vadd.f32 %v1427_v17, %v237_v19  ;;  %3374 = vmatpush3.bf16.msra.mxu0 %v3371_v20  ;;  %v739_v40 = vadd.f32 %v723_v33, %v237_v19  ;;  %v740_v43 = vadd.f32 %v724_v32, %v242_v18 }
  0x9b   :  { %v331_v34 = vmul.f32 0.1, %v299_v24  ;;  %vm314_vm8 = vcmp.gt.f32.partialorder %v298_v27, 0.0  ;;  %vm315_vm9 = vcmp.gt.f32.partialorder %v299_v24, 0.0  ;;  %v330_v39 = vmul.f32 0.1, %v298_v27 }
  0x9c   :  { %v150_v37 = vpop.permute.xlu1 %149  ;;  %v145_v38 = vpop.permute.xlu0 %144  ;;  %v771_v63 = vmul.f32 0.1, %v739_v40  ;;  %v772_v7 = vmul.f32 0.1, %v740_v43  ;;  %vm755_vm12 = vcmp.gt.f32.partialorder %v739_v40, 0.0  ;;  %vm756_vm13 = vcmp.gt.f32.partialorder %v740_v43, 0.0 }
  0x9d   :  { %v205_v44 = vmul.f32 %v4011_v12, %v150_v37  ;;  %v1078_v45 = vmul.f32 %v4005_v10, %v150_v37  ;;  %v1430_v46 = vmul.f32 %v4008_v11, %v150_v37  ;;  %v204_v47 = vmul.f32 %v4011_v12, %v145_v38 }
  0x9e   :  { %v346_v50 = vsel %vm314_vm8, %v298_v27, %v330_v39  ;;  %v347_v52 = vsel %vm315_vm9, %v299_v24, %v331_v34  ;;  %v1077_v55 = vmul.f32 %v4005_v10, %v145_v38  ;;  %v1429_v56 = vmul.f32 %v4008_v11, %v145_v38 }
  0x9f   :  { %v3375_v30 = vpack.c.bf16 %v347_v52, %v346_v50  ;;  %v725_v8 = vmul.f32 %v4014_v13, %v145_v38  ;;  %v726_v14 = vmul.f32 %v4014_v13, %v150_v37  ;;  %v784_v19 = vsel %vm752_vm6, %v4047_v51, %v4065_v5 }
  0xa0   :  { %v252_v57 = vpop.permute.xlu1 %251  ;;  %v247_v58 = vpop.permute.xlu0 %246  ;;  %v785_v20 = vsel %vm753_vm10, %v4061_v2, %v769_v41  ;;  %v786_v24 = vsel %vm754_vm11, %v4073_v23, %v770_v21  ;;  %v787_v33 = vsel %vm755_vm12, %v739_v40, %v771_v63  ;;  %v788_v34 = vsel %vm756_vm13, %v740_v43, %v772_v7 }
  0xa1   :  { %v301_v60 = vadd.f32 %v252_v57, %v205_v44  ;;  %v4103_v61 = vadd.f32 %v1078_v45, %v252_v57  ;;  %v4105_v62 = vadd.f32 %v1430_v46, %v252_v57  ;;  %v300_v1 = vadd.f32 %v247_v58, %v204_v47  ;;  %3376 = vmatprep.subr.bf16.mxu0 %v3375_v30 }
  0xa2   :  { %v4107_v3 = vadd.f32 %v1077_v55, %v247_v58  ;;  %v4109_v6 = vadd.f32 %v1429_v56, %v247_v58  ;;  %3378 = vmatpush3.bf16.msra.mxu0 %v3375_v30  ;;  %v741_v18 = vadd.f32 %v725_v8, %v247_v58  ;;  %v742_v27 = vadd.f32 %v726_v14, %v252_v57 }
  0xa3   :  { %v333_v9 = vmul.f32 0.1, %v301_v60  ;;  %vm316_vm14 = vcmp.gt.f32.partialorder %v300_v1, 0.0  ;;  %vm317_vm15 = vcmp.gt.f32.partialorder %v301_v60, 0.0  ;;  %v332_v17 = vmul.f32 0.1, %v300_v1 }
  0xa4   :  { %v160_v15 = vpop.permute.xlu1 %159  ;;  %v155_v16 = vpop.permute.xlu0 %154  ;;  %v773_v43 = vmul.f32 0.1, %v741_v18  ;;  %v774_v50 = vmul.f32 0.1, %v742_v27  ;;  %vm757_vm0 = vcmp.gt.f32.partialorder %v741_v18, 0.0  ;;  %vm758_vm1 = vcmp.gt.f32.partialorder %v742_v27, 0.0 }
  0xa5   :  { %v207_v32 = vmul.f32 %v4011_v12, %v160_v15  ;;  %v1080_v36 = vmul.f32 %v4005_v10, %v160_v15  ;;  %v1432_v37 = vmul.f32 %v4008_v11, %v160_v15  ;;  %v348_v38 = vsel %vm316_vm14, %v300_v1, %v332_v17 }
  0xa6   :  { %v349_v39 = vsel %vm317_vm15, %v301_v60, %v333_v9  ;;  %v206_v51 = vmul.f32 %v4011_v12, %v155_v16  ;;  %v1079_v5 = vmul.f32 %v4005_v10, %v155_v16  ;;  %v1431_v2 = vmul.f32 %v4008_v11, %v155_v16 }
  0xa7   :  { %v3379_v23 = vpack.c.bf16 %v349_v39, %v348_v38  ;;  %v727_v52 = vmul.f32 %v4014_v13, %v155_v16  ;;  %v728_v56 = vmul.f32 %v4014_v13, %v160_v15  ;;  %v4140_v63 = vpack.c.bf16 %v784_v19, %v4057_v0 }
  0xa8   :  { %v262_v41 = vpop.permute.xlu1 %261  ;;  %v257_v42 = vpop.permute.xlu0 %256  ;;  %v4142_v1 = vpack.c.bf16 %v786_v24, %v785_v20  ;;  %v4144_v7 = vpack.c.bf16 %v788_v34, %v787_v33  ;;  %v789_v14 = vsel %vm757_vm0, %v741_v18, %v773_v43  ;;  %v790_v16 = vsel %vm758_vm1, %v742_v27, %v774_v50 }
  0xa9   :  { %v303_v44 = vadd.f32 %v262_v41, %v207_v32  ;;  %v4129_v45 = vadd.f32 %v1080_v36, %v262_v41  ;;  %v4131_v40 = vadd.f32 %v1432_v37, %v262_v41  ;;  %v302_v21 = vadd.f32 %v257_v42, %v206_v51  ;;  %3380 = vmatprep.subr.bf16.mxu0 %v3379_v23 }
  0xaa   :  { %v4133_v46 = vadd.f32 %v1079_v5, %v257_v42  ;;  %v4135_v47 = vadd.f32 %v1431_v2, %v257_v42  ;;  %3382 = vmatpush3.bf16.msra.mxu0 %v3379_v23  ;;  %v743_v60 = vadd.f32 %v727_v52, %v257_v42  ;;  %v744_v8 = vadd.f32 %v728_v56, %v262_v41 }
  0xab   :  { %v335_v55 = vmul.f32 0.1, %v303_v44  ;;  %vm318_vm2 = vcmp.gt.f32.partialorder %v302_v21, 0.0  ;;  %vm319_vm3 = vcmp.gt.f32.partialorder %v303_v44, 0.0  ;;  %v334_v30 = vmul.f32 0.1, %v302_v21 }
  0xac   :  { %v170_v57 = vpop.permute.xlu1 %169  ;;  %v165_v58 = vpop.permute.xlu0 %164  ;;  %v775_v27 = vmul.f32 0.1, %v743_v60  ;;  %v776_v2 = vmul.f32 0.1, %v744_v8  ;;  %vm759_vm6 = vcmp.gt.f32.partialorder %v743_v60, 0.0  ;;  %vm760_vm7 = vcmp.gt.f32.partialorder %v744_v8, 0.0 }
  0xad   :  { %v209_v9 = vmul.f32 %v4011_v12, %v170_v57  ;;  %v1082_v15 = vmul.f32 %v4005_v10, %v170_v57  ;;  %v1434_v17 = vmul.f32 %v4008_v11, %v170_v57  ;;  %v350_v32 = vsel %vm318_vm2, %v302_v21, %v334_v30 }
  0xae   :  { %v351_v36 = vsel %vm319_vm3, %v303_v44, %v335_v55  ;;  %v208_v37 = vmul.f32 %v4011_v12, %v165_v58  ;;  %v1081_v0 = vmul.f32 %v4005_v10, %v165_v58  ;;  %v1433_v19 = vmul.f32 %v4008_v11, %v165_v58 }
  0xaf   :  { %v3383_v33 = vpack.c.bf16 %v351_v36, %v350_v32  ;;  %v729_v41 = vmul.f32 %v4014_v13, %v165_v58  ;;  %v730_v23 = vmul.f32 %v4014_v13, %v170_v57  ;;  %v4164_v52 = vpack.c.bf16 %v790_v16, %v789_v14 }
  0xb0   :  { %v272_v20 = vpop.permute.xlu1 %271  ;;  %v267_v24 = vpop.permute.xlu0 %266  ;;  %v1121_v55 = vmul.f32 0.1, %v4049_v53  ;;  %v1122_v56 = vmul.f32 0.1, %v4043_v48  ;;  %vm1107_vm14 = vcmp.gt.f32.partialorder %v4079_v28, 0.0  ;;  %vm1108_vm2 = vcmp.gt.f32.partialorder %v4075_v25, 0.0 }
  0xb1   :  { %v305_v34 = vadd.f32 %v272_v20, %v209_v9  ;;  %v4152_v38 = vadd.f32 %v1082_v15, %v272_v20  ;;  %v4154_v18 = vadd.f32 %v1434_v17, %v272_v20  ;;  %v304_v39 = vadd.f32 %v267_v24, %v208_v37  ;;  %3384 = vmatprep.subr.bf16.mxu0 %v3383_v33 }
  0xb2   :  { %v4156_v51 = vadd.f32 %v1081_v0, %v267_v24  ;;  %v4158_v5 = vadd.f32 %v1433_v19, %v267_v24  ;;  %3386 = vmatpush3.bf16.msra.mxu0 %v3383_v33  ;;  %v745_v50 = vadd.f32 %v729_v41, %v267_v24  ;;  %v746_v30 = vadd.f32 %v730_v23, %v272_v20 }
  0xb3   :  { %v337_v42 = vmul.f32 0.1, %v305_v34  ;;  %vm320_vm8 = vcmp.gt.f32.partialorder %v304_v39, 0.0  ;;  %vm321_vm9 = vcmp.gt.f32.partialorder %v305_v34, 0.0  ;;  %v336_v21 = vmul.f32 0.1, %v304_v39 }
  0xb4   :  { %v180_v44 = vpop.permute.xlu1 %179  ;;  %v175_v43 = vpop.permute.xlu0 %174  ;;  %v791_v9 = vsel %vm759_vm6, %v743_v60, %v775_v27  ;;  %v792_v15 = vsel %vm760_vm7, %v744_v8, %v776_v2  ;;  %v777_v8 = vmul.f32 0.1, %v745_v50  ;;  %vm761_vm10 = vcmp.gt.f32.partialorder %v745_v50, 0.0 }
  0xb5   :  { %v211_v58 = vmul.f32 %v4011_v12, %v180_v44  ;;  %v1084_v17 = vmul.f32 %v4005_v10, %v180_v44  ;;  %v1436_v57 = vmul.f32 %v4008_v11, %v180_v44  ;;  %v352_v32 = vsel %vm320_vm8, %v304_v39, %v336_v21 }
  0xb6   :  { %v353_v36 = vsel %vm321_vm9, %v305_v34, %v337_v42  ;;  %v210_v37 = vmul.f32 %v4011_v12, %v175_v43  ;;  %v1083_v14 = vmul.f32 %v4005_v10, %v175_v43  ;;  %v1435_v16 = vmul.f32 %v4008_v11, %v175_v43 }
  0xb7   :  { %v3387_v24 = vpack.c.bf16 %v353_v36, %v352_v32  ;;  %v778_v34 = vmul.f32 0.1, %v746_v30  ;;  %v731_v41 = vmul.f32 %v4014_v13, %v175_v43  ;;  %vm762_vm11 = vcmp.gt.f32.partialorder %v746_v30, 0.0 }
  0xb8   :  { %v282_v0 = vpop.permute.xlu1 %281  ;;  %v277_v19 = vpop.permute.xlu0 %276  ;;  %v732_v23 = vmul.f32 %v4014_v13, %v180_v44  ;;  %v4184_v32 = vpack.c.bf16 %v792_v15, %v791_v9  ;;  %v1137_v36 = vsel %vm1105_vm4, %v4049_v53, %v1121_v55  ;;  %v1138_v43 = vsel %vm1106_vm5, %v4043_v48, %v1122_v56 }
  0xb9   :  { %v307_v20 = vadd.f32 %v282_v0, %v211_v58  ;;  %v4174_v33 = vadd.f32 %v1084_v17, %v282_v0  ;;  %v4176_v60 = vadd.f32 %v1436_v57, %v282_v0  ;;  %v306_v27 = vadd.f32 %v277_v19, %v210_v37  ;;  %3388 = vmatprep.subr.bf16.mxu0 %v3387_v24 }
  0xba   :  { %v4178_v2 = vadd.f32 %v1083_v14, %v277_v19  ;;  %v4180_v39 = vadd.f32 %v1435_v16, %v277_v19  ;;  %3390 = vmatpush3.bf16.msra.mxu0 %v3387_v24  ;;  %v747_v57 = vadd.f32 %v731_v41, %v277_v19  ;;  %v4192_v37 = vadd.f32 %v732_v23, %v282_v0 }
  0xbb   :  { %v339_v42 = vmul.f32 0.1, %v307_v20  ;;  %vm322_vm12 = vcmp.gt.f32.partialorder %v306_v27, 0.0  ;;  %vm323_vm13 = vcmp.gt.f32.partialorder %v307_v20, 0.0  ;;  %v338_v17 = vmul.f32 0.1, %v306_v27 }
  0xbc   :  { %v190_v21 = vpop.permute.xlu1 %189  ;;  %v185_v58 = vpop.permute.xlu0 %184  ;;  %v793_v14 = vsel %vm761_vm10, %v745_v50, %v777_v8  ;;  %v794_v44 = vsel %vm762_vm11, %v746_v30, %v778_v34  ;;  %v4199_v48 = vpack.c.bf16 %v1138_v43, %v1137_v36  ;;  %vm763_vm15 = vcmp.gt.f32.partialorder %v747_v57, 0.0 }
  0xbd   :  { %v213_v16 = vmul.f32 %v4011_v12, %v190_v21  ;;  %v1438_v19 = vmul.f32 %v4008_v11, %v190_v21  ;;  %v354_v9 = vsel %vm322_vm12, %v306_v27, %v338_v17  ;;  %v355_v15 = vsel %vm323_vm13, %v307_v20, %v339_v42 }
  0xbe   :  { %v212_v24 = vmul.f32 %v4011_v12, %v185_v58  ;;  %v1437_v53 = vmul.f32 %v4008_v11, %v185_v58  ;;  %v3391_v4 = vpack.c.bf16 %v355_v15, %v354_v9  ;;  %v4203_v30 = vpack.c.bf16 %v794_v44, %v793_v14 }
  0xbf   :  { %v734_v0 = vmul.f32 %v4014_v13, %v190_v21  ;;  %v1086_v8 = vmul.f32 %v4005_v10, %v190_v21  ;;  %v733_v11 = vmul.f32 %v4014_v13, %v185_v58  ;;  %v779_v34 = vmul.f32 0.1, %v747_v57 }
  0xc0   :  { %v292_v55 = vpop.permute.xlu1 %291  ;;  %v287_v41 = vpop.permute.xlu0 %286  ;;  %3392 = vmatprep.subr.bf16.mxu0 %v3391_v4  ;;  %v1085_v42 = vmul.f32 %v4005_v10, %v185_v58  ;;  %v4216_v21 = vmul.f32 0.1, %v4192_v37  ;;  %v1123_v10 = vmul.f32 0.1, %v4079_v28  ;;  %v1124_v58 = vmul.f32 0.1, %v4075_v25 }
  0xc1   :  { %v309_v56 = vadd.f32 %v292_v55, %v213_v16  ;;  %v4201_v50 = vadd.f32 %v1438_v19, %v292_v55  ;;  %v308_v20 = vadd.f32 %v287_v41, %v212_v24  ;;  %v4207_v27 = vadd.f32 %v1437_v53, %v287_v41  ;;  %3394 = vmatpush3.bf16.msra.mxu0 %v3391_v4 }
  0xc2   :  { %v4218_v43 = vadd.f32 %v734_v0, %v292_v55  ;;  %v4220_v14 = vadd.f32 %v1086_v8, %v292_v55  ;;  %v4223_v4 = vadd.f32 %v733_v11, %v287_v41  ;;  %v1101_v16 = vadd.f32 %v1085_v42, %v287_v41 }
  0xc3   :  { %vm325_vm0 = vcmp.gt.f32.partialorder %v309_v56, 0.0  ;;  %v341_v12 = vmul.f32 0.1, %v309_v56  ;;  %vm324_vm1 = vcmp.gt.f32.partialorder %v308_v20, 0.0  ;;  %v340_v36 = vmul.f32 0.1, %v308_v20 }
  0xc4   :  { %v4211_v23 = vpop.permute.xlu1 %365  ;;  %v4213_v17 = vpop.permute.xlu0 %360  ;;  %v4228_v9 = vsel %vm763_vm15, %v747_v57, %v779_v34  ;;  %vm1109_vm3 = vcmp.gt.f32.partialorder %v4107_v3, 0.0  ;;  %vm1455_vm4 = vcmp.gt.f32.partialorder %v4025_v22, 0.0  ;;  %v1139_v53 = vsel %vm1107_vm14, %v4079_v28, %v1123_v10  ;;  %v4250_v28 = vld [vmem:[%s5662_s4 + $0x8] sm:$0xff] }
  0xc5   :  { %v357_v13 = vsel %vm325_vm0, %v309_v56, %v341_v12  ;;  %v356_v44 = vsel %vm324_vm1, %v308_v20, %v340_v36  ;;  %v1140_v55 = vsel %vm1108_vm2, %v4075_v25, %v1124_v58  ;;  %vm1110_vm5 = vcmp.gt.f32.partialorder %v4103_v61, 0.0  ;;  %v4260_v20 = vld [vmem:[%s5662_s4 + $0x10] sm:$0xff] }
  0xc6   :  { %v3395_v19 = vpack.c.bf16 %v357_v13, %v356_v44  ;;  %v1125_v41 = vmul.f32 0.1, %v4107_v3  ;;  %v4242_v57 = vpack.c.bf16 %v1140_v55, %v1139_v53  ;;  %v1126_v56 = vmul.f32 0.1, %v4103_v61  ;;  %v4283_v44 = vld [vmem:[%s5662_s4 + $0x18] sm:$0xff] }
  0xc7   :  { %vm1111_vm6 = vcmp.gt.f32.partialorder %v4133_v46, 0.0  ;;  %vm1112_vm7 = vcmp.gt.f32.partialorder %v4129_v45, 0.0  ;;  %v1127_v0 = vmul.f32 0.1, %v4133_v46  ;;  %v1128_v8 = vmul.f32 0.1, %v4129_v45 }
  0xc8   :  { %v4232_v15 = vpop.permute.xlu1 %375  ;;  %v4234_v24 = vpop.permute.xlu0 %370  ;;  %3396 = vmatprep.subr.bf16.mxu0 %v3395_v19  ;;  %v1141_v25 = vsel %vm1109_vm3, %v4107_v3, %v1125_v41  ;;  %vm1113_vm8 = vcmp.gt.f32.partialorder %v4156_v51, 0.0  ;;  %v1142_v11 = vsel %vm1110_vm5, %v4103_v61, %v1126_v56  ;;  %vm1114_vm9 = vcmp.gt.f32.partialorder %v4152_v38, 0.0 }
  0xc9   :  { %3398 = vmatpush3.bf16.msra.mxu0 %v3395_v19  ;;  %v1129_v12 = vmul.f32 0.1, %v4156_v51  ;;  %v1130_v3 = vmul.f32 0.1, %v4152_v38  ;;  %v4270_v36 = vpack.c.bf16 %v1142_v11, %v1141_v25  ;;  %v1143_v13 = vsel %vm1111_vm6, %v4133_v46, %v1127_v0 }
  0xca   :  { %3424 = vmatprep.subr.bf16.mxu0 %v4140_v63  ;;  %v1144_v61 = vsel %vm1112_vm7, %v4129_v45, %v1128_v8  ;;  %vm1115_vm10 = vcmp.gt.f32.partialorder %v4178_v2, 0.0  ;;  %vm1116_vm11 = vcmp.gt.f32.partialorder %v4174_v33, 0.0  ;;  %v4297_v45 = vld [vmem:[%s5662_s4 + $0x20] sm:$0xff]  ;;  %v1131_v53 = vmul.f32 0.1, %v4178_v2 }
  0xcb   :  { %v4285_v10 = vpack.c.bf16 %v1144_v61, %v1143_v13  ;;  %v1145_v58 = vsel %vm1113_vm8, %v4156_v51, %v1129_v12  ;;  %v1146_v46 = vsel %vm1114_vm9, %v4152_v38, %v1130_v3  ;;  %v1132_v55 = vmul.f32 0.1, %v4174_v33 }
  0xcc   :  { %v4266_v34 = vpop.permute.xlu1 %385  ;;  %v4268_v42 = vpop.permute.xlu0 %380  ;;  %3036 = vmatmul.mubr.f32.vlgmr.msra.gmra.mrb[0].mxu0 %v4250_v28  ;;  %v4299_v19 = vpack.c.bf16 %v1146_v46, %v1145_v58  ;;  %vm1117_vm12 = vcmp.gt.f32.partialorder %v1101_v16, 0.0  ;;  %vm1118_vm13 = vcmp.gt.f32.partialorder %v4220_v14, 0.0  ;;  %v1133_v38 = vmul.f32 0.1, %v1101_v16 }
  0xcd   :  { %3426 = vmatpush3.bf16.msra.mxu0 %v4140_v63  ;;  %3038 = vmatprep.mubr.f32.mxu0 %v4260_v20  ;;  %v1134_v63 = vmul.f32 0.1, %v4220_v14  ;;  %vm1456_vm14 = vcmp.gt.f32.partialorder %v4032_v31, 0.0  ;;  %v1147_v56 = vsel %vm1115_vm10, %v4178_v2, %v1131_v53  ;;  %v1148_v25 = vsel %vm1116_vm11, %v4174_v33, %v1132_v55  ;;  %v4329_v33 = vld [vmem:[%s5662_s4 + $0x28] sm:$0xff] }
  0xce   :  { %3428 = vmatprep.subr.bf16.mxu0 %v4142_v1  ;;  %v1471_v0 = vmul.f32 0.1, %v4025_v22  ;;  %v1472_v8 = vmul.f32 0.1, %v4032_v31  ;;  %v4320_v11 = vpack.c.bf16 %v1148_v25, %v1147_v56  ;;  %v1149_v12 = vsel %vm1117_vm12, %v1101_v16, %v1133_v38  ;;  %v4372_v56 = vld [vmem:[%s5662_s4 + $0x38] sm:$0xff] }
  0xcf   :  { %v1150_v3 = vsel %vm1118_vm13, %v4220_v14, %v1134_v63  ;;  %vm1457_vm15 = vcmp.gt.f32.partialorder %v4051_v54, 0.0  ;;  %vm764_vm0 = vcmp.gt.f32.partialorder %v4192_v37, 0.0  ;;  %vm1458_vm1 = vcmp.gt.f32.partialorder %v4045_v49, 0.0 }
  0xd0   :  { %v4307_v51 = vpop.permute.xlu1 %395  ;;  %v4309_v41 = vpop.permute.xlu0 %390  ;;  %3039 = vmatmul.mubr.f32.gmra.mrb[2].mxu0 %v4283_v44  ;;  %v4332_v2 = vpack.c.bf16 %v1150_v3, %v1149_v12  ;;  %v1487_v16 = vsel %vm1455_vm4, %v4025_v22, %v1471_v0  ;;  %v1488_v14 = vsel %vm1456_vm14, %v4032_v31, %v1472_v8  ;;  %v1473_v61 = vmul.f32 0.1, %v4051_v54 }
  0xd1   :  { %3430 = vmatpush3.bf16.msra.mxu0 %v4142_v1  ;;  %3041 = vmatprep.mubr.f32.mxu0 %v4297_v45  ;;  %v4345_v1 = vld [vmem:[%s5662_s4 + $0x30] sm:$0xff]  ;;  %v4347_v13 = vpack.c.bf16 %v1488_v14, %v1487_v16  ;;  %v1474_v58 = vmul.f32 0.1, %v4045_v49  ;;  %vm1459_vm2 = vcmp.gt.f32.partialorder %v4081_v29, 0.0  ;;  %vm1460_vm3 = vcmp.gt.f32.partialorder %v4077_v26, 0.0 }
  0xd2   :  { %3432 = vmatprep.subr.bf16.mxu0 %v4144_v7  ;;  %v1475_v46 = vmul.f32 0.1, %v4081_v29  ;;  %v1476_v53 = vmul.f32 0.1, %v4077_v26  ;;  %vm1461_vm4 = vcmp.gt.f32.partialorder %v4109_v6, 0.0  ;;  %v1489_v55 = vsel %vm1457_vm15, %v4051_v54, %v1473_v61 }
  0xd3   :  { %v1490_v38 = vsel %vm1458_vm1, %v4045_v49, %v1474_v58  ;;  %vm1462_vm5 = vcmp.gt.f32.partialorder %v4105_v62, 0.0  ;;  %v1477_v63 = vmul.f32 0.1, %v4109_v6  ;;  %v1478_v0 = vmul.f32 0.1, %v4105_v62 }
  0xd4   :  { %v4352_v22 = vpop.permute.xlu1 %405  ;;  %v4354_v31 = vpop.permute.xlu0 %400  ;;  %3042 = vmatmul.mubr.f32.gmra.mrb[4].mxu0 %v4329_v33  ;;  %v4374_v25 = vpack.c.bf16 %v1490_v38, %v1489_v55  ;;  %v1491_v54 = vsel %vm1459_vm2, %v4081_v29, %v1475_v46  ;;  %v1492_v49 = vsel %vm1460_vm3, %v4077_v26, %v1476_v53  ;;  %vm1463_vm6 = vcmp.gt.f32.partialorder %v4135_v47, 0.0 }
  0xd5   :  { %3434 = vmatpush3.bf16.msra.mxu0 %v4144_v7  ;;  %3044 = vmatprep.mubr.f32.mxu0 %v4345_v1  ;;  %v4385_v7 = vld [vmem:[%s5662_s4 + $0x40] sm:$0xff]  ;;  %v4387_v8 = vpack.c.bf16 %v1492_v49, %v1491_v54  ;;  %v1493_v12 = vsel %vm1461_vm4, %v4109_v6, %v1477_v63  ;;  %vm1464_vm7 = vcmp.gt.f32.partialorder %v4131_v40, 0.0  ;;  %v1494_v3 = vsel %vm1462_vm5, %v4105_v62, %v1478_v0  ;;  %v4415_v62 = vld [vmem:[%s5662_s4 + $0x48] sm:$0xff] }
  0xd6   :  { %3436 = vmatprep.subr.bf16.mxu0 %v4164_v52  ;;  %v1479_v16 = vmul.f32 0.1, %v4135_v47  ;;  %v1480_v14 = vmul.f32 0.1, %v4131_v40  ;;  %vm1465_vm8 = vcmp.gt.f32.partialorder %v4158_v5, 0.0  ;;  %v4405_v6 = vpack.c.bf16 %v1494_v3, %v1493_v12 }
  0xd7   :  { %vm1466_vm9 = vcmp.gt.f32.partialorder %v4154_v18, 0.0  ;;  %v1481_v61 = vmul.f32 0.1, %v4158_v5  ;;  %v1482_v58 = vmul.f32 0.1, %v4154_v18  ;;  %vm1467_vm10 = vcmp.gt.f32.partialorder %v4180_v39, 0.0 }
  0xd8   :  { %v4394_v26 = vpop.permute.xlu1 %415  ;;  %v4396_v29 = vpop.permute.xlu0 %410  ;;  %3045 = vmatmul.mubr.f32.gmra.mrb[6].mxu0 %v4372_v56  ;;  %v1495_v46 = vsel %vm1463_vm6, %v4135_v47, %v1479_v16  ;;  %v1496_v53 = vsel %vm1464_vm7, %v4131_v40, %v1480_v14  ;;  %vm1468_vm11 = vcmp.gt.f32.partialorder %v4176_v60, 0.0  ;;  %v1483_v40 = vmul.f32 0.1, %v4180_v39  ;;  %v4462_v16 = vld [vmem:[%s5662_s4 + $0x58] sm:$0xff] }
  0xd9   :  { %3438 = vmatpush3.bf16.msra.mxu0 %v4164_v52  ;;  %3047 = vmatprep.mubr.f32.mxu0 %v4385_v7  ;;  %v4429_v52 = vld [vmem:[%s5662_s4 + $0x50] sm:$0xff]  ;;  %v4431_v55 = vpack.c.bf16 %v1496_v53, %v1495_v46  ;;  %v1497_v47 = vsel %vm1465_vm8, %v4158_v5, %v1481_v61  ;;  %v1498_v38 = vsel %vm1466_vm9, %v4154_v18, %v1482_v58  ;;  %v1484_v0 = vmul.f32 0.1, %v4176_v60 }
  0xda   :  { %3440 = vmatprep.subr.bf16.mxu0 %v4184_v32  ;;  %v4442_v49 = vpack.c.bf16 %v1498_v38, %v1497_v47  ;;  %vm1469_vm12 = vcmp.gt.f32.partialorder %v4207_v27, 0.0  ;;  %vm1470_vm13 = vcmp.gt.f32.partialorder %v4201_v50, 0.0  ;;  %v796_v18 = vsel %vm764_vm0, %v4192_v37, %v4216_v21 }
  0xdb   :  { %v1499_v5 = vsel %vm1467_vm10, %v4180_v39, %v1483_v40  ;;  %v1485_v12 = vmul.f32 0.1, %v4207_v27  ;;  %v1486_v3 = vmul.f32 0.1, %v4201_v50  ;;  %vm765_vm14 = vcmp.gt.f32.partialorder %v4223_v4, 0.0 }
  0xdc   :  { %v4438_v63 = vpop.permute.xlu1 %425  ;;  %v4440_v54 = vpop.permute.xlu0 %420  ;;  %3048 = vmatmul.mubr.f32.gmra.mrb[8].mxu0 %v4415_v62  ;;  %v781_v37 = vmul.f32 0.1, %v4223_v4  ;;  %v782_v21 = vmul.f32 0.1, %v4218_v43  ;;  %v1500_v39 = vsel %vm1468_vm11, %v4176_v60, %v1484_v0  ;;  %vm766_vm15 = vcmp.gt.f32.partialorder %v4218_v43, 0.0 }
  0xdd   :  { %5707 = vst [vmem:[#allocation8_spill] sm:$0xff] %v4440_v54  ;;  %3442 = vmatpush3.bf16.msra.mxu0 %v4184_v32  ;;  %3050 = vmatprep.mubr.f32.mxu0 %v4429_v52  ;;  %v4474_v32 = vld [vmem:[%s5662_s4 + $0x60] sm:$0xff]  ;;  %v4477_v14 = vpack.c.bf16 %v1500_v39, %v1499_v5  ;;  %v1501_v61 = vsel %vm1469_vm12, %v4207_v27, %v1485_v12  ;;  %v4498_v27 = vld [vmem:[%s5662_s4 + $0x68] sm:$0xff]  ;;  %v4505_v40 = vadd.s32 384, %v4034_v35  ;;  %v4516_v0 = vadd.s32 896, %v4034_v35 }
  0xde   :  { %3444 = vmatprep.subr.bf16.mxu0 %v4203_v30  ;;  %v1502_v58 = vsel %vm1470_vm13, %v4201_v50, %v1486_v3  ;;  %v3447_v47 = vpack.c.bf16 %v796_v18, %v4228_v9  ;;  %v797_v50 = vsel %vm765_vm14, %v4223_v4, %v781_v37  ;;  %v798_v38 = vsel %vm766_vm15, %v4218_v43, %v782_v21  ;;  %v4533_v3 = vld [vmem:[%s5662_s4 + $0x78] sm:$0xff] }
  0xdf   :  { %v4489_v53 = vpack.c.bf16 %v1502_v58, %v1501_v61  ;;  %v4513_v9 = vadd.s32 256, %v4034_v35  ;;  %v4523_v43 = vadd.s32 512, %v4034_v35  ;;  %v4526_v5 = vadd.s32 768, %v4034_v35  ;;  %v4568_v58 = vld [vmem:[%s5662_s4] sm:$0xff] }
  0xe0   :  { %v4485_v60 = vpop.permute.xlu1 %435  ;;  %v4487_v46 = vpop.permute.xlu0 %430  ;;  %3051 = vmatmul.mubr.f32.gmra.mrb[10].mxu0 %v4462_v16  ;;  %v3451_v12 = vpack.c.bf16 %v798_v38, %v797_v50  ;;  %v4559_v39 = vadd.s32 640, %v4034_v35  ;;  %v5710_v61 = vmov 0  ;;  %v5713_v38 = vmov 0 }
  0xe1   :  { %5708 = vst [vmem:[#allocation9_spill] sm:$0xff] %v4485_v60  ;;  %5709 = vst [vmem:[#allocation10_spill] sm:$0xff] %v4487_v46  ;;  %3446 = vmatpush3.bf16.msra.mxu0 %v4203_v30  ;;  %3053 = vmatprep.mubr.f32.mxu0 %v4474_v32  ;;  %v4510_v30 = vld [vmem:[%s5662_s4 + $0x70] sm:$0xff]  ;;  %v5731_v46 = vmov 0  ;;  %v5740_v60 = vmov 0  ;;  %v5772_v54 = vmov 0 }
  0xe2   :  { %3448 = vmatprep.subr.bf16.mxu0 %v3447_v47 }
  0xe4   :  { %v4518_v18 = vpop.permute.xlu1 %1797  ;;  %v4520_v4 = vpop.permute.xlu0 %1794  ;;  %3054 = vmatmul.mubr.f32.gmra.mrb[12].mxu0 %v4498_v27 }
  0xe5   :  { %3450 = vmatpush3.bf16.msra.mxu0 %v3447_v47  ;;  %3056 = vmatprep.mubr.f32.mxu0 %v4510_v30  ;;  %vm1844_vm0 = vcmp.eq.s32.totalorder %v4505_v40, %v4520_v4  ;;  %vm1852_vm1 = vcmp.eq.s32.totalorder %v4505_v40, %v4518_v18  ;;  %vm1843_vm2 = vcmp.eq.s32.totalorder %v4513_v9, %v4520_v4 }
  0xe6   :  { %3452 = vmatprep.subr.bf16.mxu0 %v3451_v12  ;;  %vm1851_vm3 = vcmp.eq.s32.totalorder %v4513_v9, %v4518_v18  ;;  %vm4561_vm9 = vmpackc.low %vm1852_vm1, %vm1844_vm0 }
  0xe7   :  { %v5711_v61 = vsel %vm4561_vm9, 4294967295, %v5710_v61  ;;  %vm4596_vm1 = vmpackc.low %vm1851_vm3, %vm1843_vm2 }
  0xe8   :  { %v4545_v37 = vpop.permute.xlu1 %1803  ;;  %v4547_v21 = vpop.permute.xlu0 %1800  ;;  %3057 = vmatmul.mubr.f32.gmra.mrb[14].mxu0 %v4533_v3  ;;  %5712 = vst [vmem:[#allocation11_spill] sm:$0xff] %v5711_v61  ;;  %v5714_v38 = vsel %vm4596_vm1, 4294967295, %v5713_v38  ;;  %v5725_v61 = vmov 0 }
  0xe9   :  { %3454 = vmatpush3.bf16.msra.mxu0 %v3451_v12  ;;  %3126 = vmatprep.mubr.f32.mxu0 %v4568_v58  ;;  %vm1860_vm10 = vcmp.eq.s32.totalorder %v4505_v40, %v4547_v21  ;;  %vm1868_vm11 = vcmp.eq.s32.totalorder %v4505_v40, %v4545_v37  ;;  %vm1859_vm12 = vcmp.eq.s32.totalorder %v4513_v9, %v4547_v21  ;;  %v5716_v12 = vmov 0 }
  0xea   :  { %3480 = vmatprep.subr.bf16.mxu0 %v4101_v59  ;;  %vm1867_vm13 = vcmp.eq.s32.totalorder %v4513_v9, %v4545_v37  ;;  %5715 = vst [vmem:[#allocation12_spill] sm:$0xff] %v5714_v38  ;;  %vm4615_vm2 = vmpackc.low %vm1868_vm11, %vm1860_vm10  ;;  %v5719_v38 = vmov 0 }
  0xeb   :  { %v5717_v12 = vsel %vm4615_vm2, 4294967295, %v5716_v12  ;;  %vm4646_vm7 = vmpackc.low %vm1867_vm13, %vm1859_vm12 }
  0xec   :  { %v4586_v47 = vpop.permute.xlu1 %1809  ;;  %v4588_v50 = vpop.permute.xlu0 %1806  ;;  %3127 = vmatmul.mubr.f32.vlgmr.msra.gmra.mrb[16].mxu0 %v4250_v28  ;;  %5718 = vst [vmem:[#allocation13_spill] sm:$0xff] %v5717_v12  ;;  %v5720_v38 = vsel %vm4646_vm7, 4294967295, %v5719_v38 }
  0xed   :  { %3482 = vmatpush3.bf16.msra.mxu0 %v4101_v59  ;;  %3129 = vmatprep.mubr.f32.mxu0 %v4260_v20  ;;  %vm1876_vm3 = vcmp.eq.s32.totalorder %v4505_v40, %v4588_v50  ;;  %vm1884_vm8 = vcmp.eq.s32.totalorder %v4505_v40, %v4586_v47  ;;  %vm1875_vm14 = vcmp.eq.s32.totalorder %v4513_v9, %v4588_v50 }
  0xee   :  { %3484 = vmatprep.subr.bf16.mxu0 %v4199_v48  ;;  %vm1883_vm10 = vcmp.eq.s32.totalorder %v4513_v9, %v4586_v47  ;;  %5721 = vst [vmem:[#allocation14_spill] sm:$0xff] %v5720_v38  ;;  %vm4665_vm12 = vmpackc.low %vm1884_vm8, %vm1876_vm3  ;;  %v5722_v38 = vmov 0 }
  0xef   :  { %v5723_v38 = vsel %vm4665_vm12, 4294967295, %v5722_v38  ;;  %vm4696_vm5 = vmpackc.low %vm1883_vm10, %vm1875_vm14 }
  0xf0   :  { %v4636_v59 = vpop.permute.xlu1 %1815  ;;  %v4638_v12 = vpop.permute.xlu0 %1812  ;;  %3130 = vmatmul.mubr.f32.gmra.mrb[18].mxu0 %v4283_v44  ;;  %5724 = vst [vmem:[#allocation15_spill] sm:$0xff] %v5723_v38  ;;  %v5726_v61 = vsel %vm4696_vm5, 4294967295, %v5725_v61 }
  0xf1   :  { %3486 = vmatpush3.bf16.msra.mxu0 %v4199_v48  ;;  %3132 = vmatprep.mubr.f32.mxu0 %v4297_v45  ;;  %vm1892_vm13 = vcmp.eq.s32.totalorder %v4505_v40, %v4638_v12  ;;  %vm1900_vm6 = vcmp.eq.s32.totalorder %v4505_v40, %v4636_v59  ;;  %vm1891_vm11 = vcmp.eq.s32.totalorder %v4513_v9, %v4638_v12 }
  0xf2   :  { %3488 = vmatprep.subr.bf16.mxu0 %v4242_v57  ;;  %vm1899_vm8 = vcmp.eq.s32.totalorder %v4513_v9, %v4636_v59  ;;  %5727 = vst [vmem:[#allocation16_spill] sm:$0xff] %v5726_v61  ;;  %vm4715_vm14 = vmpackc.low %vm1900_vm6, %vm1892_vm13  ;;  %v5728_v61 = vmov 0 }
  0xf3   :  { %v5729_v61 = vsel %vm4715_vm14, 4294967295, %v5728_v61  ;;  %vm4746_vm6 = vmpackc.low %vm1899_vm8, %vm1891_vm11 }
  0xf4   :  { %v4686_v48 = vpop.permute.xlu1 %1821  ;;  %v4688_v38 = vpop.permute.xlu0 %1818  ;;  %3133 = vmatmul.mubr.f32.gmra.mrb[20].mxu0 %v4329_v33  ;;  %5730 = vst [vmem:[#allocation17_spill] sm:$0xff] %v5729_v61  ;;  %v5732_v46 = vsel %vm4746_vm6, 4294967295, %v5731_v46 }
  0xf5   :  { %3490 = vmatpush3.bf16.msra.mxu0 %v4242_v57  ;;  %3135 = vmatprep.mubr.f32.mxu0 %v4345_v1  ;;  %vm1908_vm10 = vcmp.eq.s32.totalorder %v4505_v40, %v4688_v38  ;;  %vm1916_vm4 = vcmp.eq.s32.totalorder %v4505_v40, %v4686_v48  ;;  %5733 = vst [vmem:[#allocation18_spill] sm:$0xff] %v5732_v46  ;;  %v5734_v46 = vmov 0 }
  0xf6   :  { %3492 = vmatprep.subr.bf16.mxu0 %v4270_v36  ;;  %vm4765_vm11 = vmpackc.low %vm1916_vm4, %vm1908_vm10  ;;  %vm5738_vm13 = vcmp.eq.s32.totalorder %v4513_v9, %v4688_v38  ;;  %vm5739_vm3 = vcmp.eq.s32.totalorder %v4513_v9, %v4686_v48 }
  0xf7   :  { %v5735_v46 = vsel %vm4765_vm11, 4294967295, %v5734_v46  ;;  %vm4796_vm4 = vmpackc.low %vm5739_vm3, %vm5738_vm13 }
  0xf8   :  { %v4736_v57 = vpop.permute.xlu1 %1827  ;;  %v4738_v61 = vpop.permute.xlu0 %1824  ;;  %3136 = vmatmul.mubr.f32.gmra.mrb[22].mxu0 %v4372_v56  ;;  %5736 = vst [vmem:[#allocation19_spill] sm:$0xff] %v5735_v46  ;;  %v5741_v60 = vsel %vm4796_vm4, 4294967295, %v5740_v60 }
  0xf9   :  { %3494 = vmatpush3.bf16.msra.mxu0 %v4270_v36  ;;  %3138 = vmatprep.mubr.f32.mxu0 %v4385_v7  ;;  %5742 = vst [vmem:[#allocation21_spill] sm:$0xff] %v5741_v60  ;;  %vm5743_vm3 = vcmp.eq.s32.totalorder %v4505_v40, %v4738_v61  ;;  %vm5744_vm13 = vcmp.eq.s32.totalorder %v4505_v40, %v4736_v57  ;;  %v5750_v60 = vmov 0 }
  0xfa   :  { %3496 = vmatprep.subr.bf16.mxu0 %v4285_v10  ;;  %vm4815_vm4 = vmpackc.low %vm5744_vm13, %vm5743_vm3  ;;  %vm5748_vm8 = vcmp.eq.s32.totalorder %v4513_v9, %v4738_v61  ;;  %vm5749_vm10 = vcmp.eq.s32.totalorder %v4513_v9, %v4736_v57 }
  0xfb   :  { %vm4829_vm15 = vmpackc.low %vm5749_vm10, %vm5748_vm8  ;;  %vm5754_vm8 = vcmp.eq.s32.totalorder %v4516_v0, %v4518_v18 }
  0xfc   :  { %v4786_v36 = vpop.permute.xlu1 %1830  ;;  %v4788_v46 = vpop.permute.xlu0 %633  ;;  %3139 = vmatmul.mubr.f32.gmra.mrb[24].mxu0 %v4415_v62  ;;  %v5751_v60 = vsel %vm4829_vm15, 4294967295, %v5750_v60 }
  0xfd   :  { %5737 = vst [vmem:[#allocation20_spill] sm:$0xff] %v4788_v46  ;;  %v5745_v46 = vmov 0  ;;  %3498 = vmatpush3.bf16.msra.mxu0 %v4285_v10  ;;  %3141 = vmatprep.mubr.f32.mxu0 %v4429_v52  ;;  %5752 = vst [vmem:[#allocation23_spill] sm:$0xff] %v5751_v60  ;;  %v5755_v10 = vmov 0  ;;  %vm5768_vm11 = vcmp.eq.s32.totalorder %v4505_v40, %v4786_v36 }
  0xfe   :  { %v5746_v46 = vsel %vm4815_vm4, 4294967295, %v5745_v46  ;;  %3500 = vmatprep.subr.bf16.mxu0 %v4299_v19  ;;  %vm5753_vm4 = vcmp.eq.s32.totalorder %v4516_v0, %v4520_v4 }
  0xff   :  { %5747 = vst [vmem:[#allocation22_spill] sm:$0xff] %v5746_v46  ;;  %vm4846_vm10 = vmpackc.low %vm5754_vm8, %vm5753_vm4  ;;  %vm5758_vm4 = vcmp.eq.s32.totalorder %v4523_v43, %v4520_v4  ;;  %vm5759_vm8 = vcmp.eq.s32.totalorder %v4523_v43, %v4518_v18 }
 0x100   :  { %v5756_v10 = vsel %vm4846_vm10, 4294967295, %v5755_v10  ;;  %v4858_v60 = vpop.permute.xlu1 %1836  ;;  %v4860_v46 = vpop.permute.xlu0 %1833  ;;  %vm4868_vm3 = vmpackc.low %vm5759_vm8, %vm5758_vm4  ;;  %3142 = vmatmul.mubr.f32.gmra.mrb[26].mxu0 %v4462_v16  ;;  %vm5763_vm4 = vcmp.eq.s32.totalorder %v4526_v5, %v4520_v4  ;;  %vm5764_vm8 = vcmp.eq.s32.totalorder %v4526_v5, %v4518_v18 }
 0x101   :  { %5757 = vst [vmem:[#allocation24_spill] sm:$0xff] %v5756_v10  ;;  %v5760_v10 = vmov 0  ;;  %3502 = vmatpush3.bf16.msra.mxu0 %v4299_v19  ;;  %3144 = vmatprep.mubr.f32.mxu0 %v4474_v32  ;;  %vm1948_vm13 = vcmp.eq.s32.totalorder %v4505_v40, %v4860_v46  ;;  %vm1947_vm10 = vcmp.eq.s32.totalorder %v4513_v9, %v4860_v46 }
 0x102   :  { %v5761_v10 = vsel %vm4868_vm3, 4294967295, %v5760_v10  ;;  %vm4887_vm3 = vmpackc.low %vm5764_vm8, %vm5763_vm4  ;;  %3504 = vmatprep.subr.bf16.mxu0 %v4320_v11 }
 0x103   :  { %5762 = vst [vmem:[#allocation25_spill] sm:$0xff] %v5761_v10  ;;  %v5765_v10 = vmov 0  ;;  %vm4913_vm15 = vmpackc.low %vm1948_vm13, %vm5768_vm11  ;;  %vm5771_vm11 = vcmp.eq.s32.totalorder %v4513_v9, %v4786_v36 }
 0x104   :  { %v5766_v10 = vsel %vm4887_vm3, 4294967295, %v5765_v10  ;;  %v4908_v19 = vpop.permute.xlu0 %1839  ;;  %3145 = vmatmul.mubr.f32.gmra.mrb[28].mxu0 %v4498_v27  ;;  %vm4929_vm13 = vmpackc.low %vm1947_vm10, %vm5771_vm11  ;;  %vm5778_vm10 = vcmp.eq.s32.totalorder %v4513_v9, %v4858_v60  ;;  %vm5790_vm3 = vcmp.eq.s32.totalorder %v4523_v43, %v4547_v21 }
 0x105   :  { %5767 = vst [vmem:[#allocation26_spill] sm:$0xff] %v5766_v10  ;;  %v5769_v10 = vmov 0  ;;  %v5773_v54 = vsel %vm4929_vm13, 4294967295, %v5772_v54  ;;  %vm1964_vm4 = vcmp.eq.s32.totalorder %v4505_v40, %v4908_v19  ;;  %vm1963_vm8 = vcmp.eq.s32.totalorder %v4513_v9, %v4908_v19  ;;  %3506 = vmatpush3.bf16.msra.mxu0 %v4320_v11  ;;  %3147 = vmatprep.mubr.f32.mxu0 %v4510_v30 }
 0x106   :  { %v5770_v10 = vsel %vm4913_vm15, 4294967295, %v5769_v10  ;;  %5774 = vst [vmem:[#allocation27_spill] sm:$0xff] %v5773_v54  ;;  %3508 = vmatprep.subr.bf16.mxu0 %v4332_v2  ;;  %vm5775_vm15 = vcmp.eq.s32.totalorder %v4505_v40, %v4858_v60  ;;  %v5776_v11 = vmov 0  ;;  %vm4961_vm0 = vmpackc.low %vm1963_vm8, %vm5778_vm10  ;;  %v5779_v54 = vmov 0 }
 0x107   :  { %vm4953_vm6 = vmpackc.low %vm1964_vm4, %vm5775_vm15  ;;  %v5780_v54 = vsel %vm4961_vm0, 4294967295, %v5779_v54  ;;  %vm5781_vm13 = vcmp.eq.s32.totalorder %v4559_v39, %v4547_v21  ;;  %vm5782_vm15 = vcmp.eq.s32.totalorder %v4559_v39, %v4545_v37  ;;  %v5783_v40 = vmov 0 }
 0x108   :  { %v5777_v11 = vsel %vm4953_vm6, 4294967295, %v5776_v11  ;;  %3148 = vmatmul.mubr.f32.gmra.mrb[30].mxu0 %v4533_v3  ;;  %vm4973_vm4 = vmpackc.low %vm5782_vm15, %vm5781_vm13  ;;  %vm5785_vm8 = vcmp.eq.s32.totalorder %v4516_v0, %v4547_v21  ;;  %vm5786_vm10 = vcmp.eq.s32.totalorder %v4516_v0, %v4545_v37  ;;  %vm5791_vm13 = vcmp.eq.s32.totalorder %v4523_v43, %v4545_v37 }
 0x109   :  { %3510 = vmatpush3.bf16.msra.mxu0 %v4332_v2  ;;  %3217 = vmatprep.mubr.f32.mxu0 %v4568_v58  ;;  %v5784_v40 = vsel %vm4973_vm4, 4294967295, %v5783_v40  ;;  %vm4984_vm11 = vmpackc.low %vm5786_vm10, %vm5785_vm8  ;;  %v5787_v2 = vmov 0  ;;  %v5792_v9 = vmov 0  ;;  %vm5795_vm4 = vcmp.eq.s32.totalorder %v4526_v5, %v4547_v21 }
 0x10a   :  { %3536 = vmatprep.subr.bf16.mxu0 %v4347_v13  ;;  %v5788_v2 = vsel %vm4984_vm11, 4294967295, %v5787_v2  ;;  %vm4994_vm15 = vmpackc.low %vm5791_vm13, %vm5790_vm3  ;;  %vm5796_vm8 = vcmp.eq.s32.totalorder %v4526_v5, %v4545_v37  ;;  %vm5799_vm3 = vcmp.eq.s32.totalorder %v4559_v39, %v4588_v50  ;;  %vm5800_vm13 = vcmp.eq.s32.totalorder %v4559_v39, %v4586_v47 }
 0x10b   :  { %5789 = vst [vmem:[#allocation28_spill] sm:$0xff] %v5788_v2  ;;  %v5793_v9 = vsel %vm4994_vm15, 4294967295, %v5792_v9  ;;  %vm5005_vm10 = vmpackc.low %vm5796_vm8, %vm5795_vm4  ;;  %v5797_v2 = vmov 0  ;;  %vm5804_vm4 = vcmp.eq.s32.totalorder %v4516_v0, %v4588_v50  ;;  %vm5805_vm8 = vcmp.eq.s32.totalorder %v4516_v0, %v4586_v47 }
 0x10c   :  { %5794 = vst [vmem:[#allocation29_spill] sm:$0xff] %v5793_v9  ;;  %3218 = vmatmul.mubr.f32.vlgmr.msra.gmra.mrb[32].mxu0 %v4250_v28  ;;  %v5798_v2 = vsel %vm5005_vm10, 4294967295, %v5797_v2  ;;  %vm5017_vm15 = vmpackc.low %vm5800_vm13, %vm5799_vm3  ;;  %v5801_v9 = vmov 0  ;;  %vm5809_vm11 = vcmp.eq.s32.totalorder %v4523_v43, %v4588_v50  ;;  %vm5810_vm3 = vcmp.eq.s32.totalorder %v4523_v43, %v4586_v47 }
 0x10d   :  { %3538 = vmatpush3.bf16.msra.mxu0 %v4347_v13  ;;  %3220 = vmatprep.mubr.f32.mxu0 %v4260_v20  ;;  %v5802_v9 = vsel %vm5017_vm15, 4294967295, %v5801_v9  ;;  %vm5028_vm10 = vmpackc.low %vm5805_vm8, %vm5804_vm4  ;;  %v5806_v13 = vmov 0  ;;  %vm5814_vm15 = vcmp.eq.s32.totalorder %v4526_v5, %v4588_v50  ;;  %vm5815_vm4 = vcmp.eq.s32.totalorder %v4526_v5, %v4586_v47 }
 0x10e   :  { %5803 = vst [vmem:[#allocation30_spill] sm:$0xff] %v5802_v9  ;;  %3540 = vmatprep.subr.bf16.mxu0 %v4374_v25  ;;  %v5807_v13 = vsel %vm5028_vm10, 4294967295, %v5806_v13  ;;  %vm5038_vm13 = vmpackc.low %vm5810_vm3, %vm5809_vm11  ;;  %v5811_v9 = vmov 0  ;;  %vm5818_vm11 = vcmp.eq.s32.totalorder %v4559_v39, %v4638_v12  ;;  %vm5819_vm3 = vcmp.eq.s32.totalorder %v4559_v39, %v4636_v59 }
 0x10f   :  { %5808 = vst [vmem:[#allocation31_spill] sm:$0xff] %v5807_v13  ;;  %v5812_v9 = vsel %vm5038_vm13, 4294967295, %v5811_v9  ;;  %vm5049_vm8 = vmpackc.low %vm5815_vm4, %vm5814_vm15  ;;  %v5816_v13 = vmov 0  ;;  %vm5823_vm15 = vcmp.eq.s32.totalorder %v4516_v0, %v4638_v12  ;;  %vm5824_vm4 = vcmp.eq.s32.totalorder %v4516_v0, %v4636_v59 }
 0x110   :  { %5813 = vst [vmem:[#allocation32_spill] sm:$0xff] %v5812_v9  ;;  %3221 = vmatmul.mubr.f32.gmra.mrb[34].mxu0 %v4283_v44  ;;  %v5817_v13 = vsel %vm5049_vm8, 4294967295, %v5816_v13  ;;  %vm5061_vm13 = vmpackc.low %vm5819_vm3, %vm5818_vm11  ;;  %v5820_v9 = vmov 0  ;;  %vm5828_vm10 = vcmp.eq.s32.totalorder %v4523_v43, %v4638_v12  ;;  %vm5829_vm11 = vcmp.eq.s32.totalorder %v4523_v43, %v4636_v59 }
 0x111   :  { %3542 = vmatpush3.bf16.msra.mxu0 %v4374_v25  ;;  %3223 = vmatprep.mubr.f32.mxu0 %v4297_v45  ;;  %v5821_v9 = vsel %vm5061_vm13, 4294967295, %v5820_v9  ;;  %vm5072_vm8 = vmpackc.low %vm5824_vm4, %vm5823_vm15  ;;  %v5825_v25 = vmov 0  ;;  %vm5833_vm13 = vcmp.eq.s32.totalorder %v4526_v5, %v4638_v12  ;;  %vm5834_vm15 = vcmp.eq.s32.totalorder %v4526_v5, %v4636_v59 }
 0x112   :  { %5822 = vst [vmem:[#allocation33_spill] sm:$0xff] %v5821_v9  ;;  %3544 = vmatprep.subr.bf16.mxu0 %v4387_v8  ;;  %v5826_v25 = vsel %vm5072_vm8, 4294967295, %v5825_v25  ;;  %vm5082_vm3 = vmpackc.low %vm5829_vm11, %vm5828_vm10  ;;  %v5830_v9 = vmov 0  ;;  %vm5837_vm10 = vcmp.eq.s32.totalorder %v4559_v39, %v4688_v38  ;;  %vm5838_vm11 = vcmp.eq.s32.totalorder %v4559_v39, %v4686_v48 }
 0x113   :  { %5827 = vst [vmem:[#allocation34_spill] sm:$0xff] %v5826_v25  ;;  %v5831_v9 = vsel %vm5082_vm3, 4294967295, %v5830_v9  ;;  %vm5093_vm4 = vmpackc.low %vm5834_vm15, %vm5833_vm13  ;;  %v5835_v25 = vmov 0  ;;  %vm5842_vm13 = vcmp.eq.s32.totalorder %v4516_v0, %v4688_v38  ;;  %vm5843_vm15 = vcmp.eq.s32.totalorder %v4516_v0, %v4686_v48 }
 0x114   :  { %5832 = vst [vmem:[#allocation35_spill] sm:$0xff] %v5831_v9  ;;  %3224 = vmatmul.mubr.f32.gmra.mrb[36].mxu0 %v4329_v33  ;;  %v5836_v25 = vsel %vm5093_vm4, 4294967295, %v5835_v25  ;;  %vm5105_vm3 = vmpackc.low %vm5838_vm11, %vm5837_vm10  ;;  %v5839_v9 = vmov 0  ;;  %vm5847_vm8 = vcmp.eq.s32.totalorder %v4523_v43, %v4688_v38  ;;  %vm5848_vm10 = vcmp.eq.s32.totalorder %v4523_v43, %v4686_v48 }
 0x115   :  { %3546 = vmatpush3.bf16.msra.mxu0 %v4387_v8  ;;  %3226 = vmatprep.mubr.f32.mxu0 %v4345_v1  ;;  %v5840_v9 = vsel %vm5105_vm3, 4294967295, %v5839_v9  ;;  %vm5116_vm4 = vmpackc.low %vm5843_vm15, %vm5842_vm13  ;;  %v5844_v8 = vmov 0  ;;  %vm5852_vm3 = vcmp.eq.s32.totalorder %v4526_v5, %v4688_v38  ;;  %vm5853_vm13 = vcmp.eq.s32.totalorder %v4526_v5, %v4686_v48 }
 0x116   :  { %5841 = vst [vmem:[#allocation36_spill] sm:$0xff] %v5840_v9  ;;  %3548 = vmatprep.subr.bf16.mxu0 %v4405_v6  ;;  %v5845_v8 = vsel %vm5116_vm4, 4294967295, %v5844_v8  ;;  %vm5126_vm11 = vmpackc.low %vm5848_vm10, %vm5847_vm8  ;;  %v5849_v9 = vmov 0  ;;  %vm5856_vm8 = vcmp.eq.s32.totalorder %v4559_v39, %v4738_v61  ;;  %vm5857_vm10 = vcmp.eq.s32.totalorder %v4559_v39, %v4736_v57 }
 0x117   :  { %5846 = vst [vmem:[#allocation37_spill] sm:$0xff] %v5845_v8  ;;  %v5850_v9 = vsel %vm5126_vm11, 4294967295, %v5849_v9  ;;  %vm5137_vm15 = vmpackc.low %vm5853_vm13, %vm5852_vm3  ;;  %v5854_v8 = vmov 0  ;;  %vm5861_vm3 = vcmp.eq.s32.totalorder %v4516_v0, %v4738_v61  ;;  %vm5862_vm13 = vcmp.eq.s32.totalorder %v4516_v0, %v4736_v57 }
 0x118   :  { %5851 = vst [vmem:[#allocation38_spill] sm:$0xff] %v5850_v9  ;;  %3227 = vmatmul.mubr.f32.gmra.mrb[38].mxu0 %v4372_v56  ;;  %v5855_v8 = vsel %vm5137_vm15, 4294967295, %v5854_v8  ;;  %vm5149_vm11 = vmpackc.low %vm5857_vm10, %vm5856_vm8  ;;  %v5858_v9 = vmov 0  ;;  %vm5866_vm4 = vcmp.eq.s32.totalorder %v4523_v43, %v4738_v61  ;;  %vm5867_vm8 = vcmp.eq.s32.totalorder %v4523_v43, %v4736_v57 }
 0x119   :  { %3550 = vmatpush3.bf16.msra.mxu0 %v4405_v6  ;;  %3229 = vmatprep.mubr.f32.mxu0 %v4385_v7  ;;  %v5859_v9 = vsel %vm5149_vm11, 4294967295, %v5858_v9  ;;  %vm5160_vm15 = vmpackc.low %vm5862_vm13, %vm5861_vm3  ;;  %v5863_v6 = vmov 0  ;;  %vm5871_vm11 = vcmp.eq.s32.totalorder %v4526_v5, %v4738_v61  ;;  %vm5872_vm3 = vcmp.eq.s32.totalorder %v4526_v5, %v4736_v57 }
 0x11a   :  { %5860 = vst [vmem:[#allocation39_spill] sm:$0xff] %v5859_v9  ;;  %3552 = vmatprep.subr.bf16.mxu0 %v4431_v55  ;;  %v5864_v6 = vsel %vm5160_vm15, 4294967295, %v5863_v6  ;;  %vm5170_vm10 = vmpackc.low %vm5867_vm8, %vm5866_vm4  ;;  %v5868_v9 = vmov 0  ;;  %vm5876_vm4 = vcmp.eq.s32.totalorder %v4559_v39, %v4786_v36  ;;  %vm5877_vm8 = vcmp.eq.s32.totalorder %v4559_v39, %v4860_v46 }
 0x11b   :  { %5865 = vst [vmem:[#allocation40_spill] sm:$0xff] %v5864_v6  ;;  %v5869_v9 = vsel %vm5170_vm10, 4294967295, %v5868_v9  ;;  %vm5181_vm13 = vmpackc.low %vm5872_vm3, %vm5871_vm11  ;;  %v5873_v6 = vmov 0  ;;  %vm5881_vm11 = vcmp.eq.s32.totalorder %v4516_v0, %v4786_v36  ;;  %vm5882_vm3 = vcmp.eq.s32.totalorder %v4516_v0, %v4860_v46 }
 0x11c   :  { %5870 = vst [vmem:[#allocation41_spill] sm:$0xff] %v5869_v9  ;;  %3230 = vmatmul.mubr.f32.gmra.mrb[40].mxu0 %v4415_v62  ;;  %v5874_v6 = vsel %vm5181_vm13, 4294967295, %v5873_v6  ;;  %vm5193_vm10 = vmpackc.low %vm5877_vm8, %vm5876_vm4  ;;  %v5878_v9 = vmov 0  ;;  %vm5886_vm15 = vcmp.eq.s32.totalorder %v4523_v43, %v4786_v36  ;;  %vm5887_vm4 = vcmp.eq.s32.totalorder %v4523_v43, %v4860_v46 }
 0x11d   :  { %5875 = vst [vmem:[#allocation42_spill] sm:$0xff] %v5874_v6  ;;  %3554 = vmatpush3.bf16.msra.mxu0 %v4431_v55  ;;  %3232 = vmatprep.mubr.f32.mxu0 %v4429_v52  ;;  %v5879_v9 = vsel %vm5193_vm10, 4294967295, %v5878_v9  ;;  %vm5204_vm13 = vmpackc.low %vm5882_vm3, %vm5881_vm11  ;;  %v5883_v55 = vmov 0  ;;  %vm5891_vm10 = vcmp.eq.s32.totalorder %v4526_v5, %v4786_v36  ;;  %vm5892_vm11 = vcmp.eq.s32.totalorder %v4526_v5, %v4860_v46 }
 0x11e   :  { %5880 = vst [vmem:[#allocation43_spill] sm:$0xff] %v5879_v9  ;;  %3556 = vmatprep.subr.bf16.mxu0 %v4442_v49  ;;  %v5884_v55 = vsel %vm5204_vm13, 4294967295, %v5883_v55  ;;  %vm5214_vm8 = vmpackc.low %vm5887_vm4, %vm5886_vm15  ;;  %v5888_v9 = vmov 0  ;;  %vm5895_vm15 = vcmp.eq.s32.totalorder %v4559_v39, %v4858_v60  ;;  %vm5896_vm4 = vcmp.eq.s32.totalorder %v4559_v39, %v4908_v19 }
 0x11f   :  { %5885 = vst [vmem:[#allocation44_spill] sm:$0xff] %v5884_v55  ;;  %v5889_v9 = vsel %vm5214_vm8, 4294967295, %v5888_v9  ;;  %vm5225_vm3 = vmpackc.low %vm5892_vm11, %vm5891_vm10  ;;  %v5893_v55 = vmov 0  ;;  %v5243_v6 = vadd.s32 128, %v4034_v35  ;;  %vm5900_vm10 = vcmp.eq.s32.totalorder %v4516_v0, %v4858_v60 }
 0x120   :  { %5890 = vst [vmem:[#allocation45_spill] sm:$0xff] %v5889_v9  ;;  %3233 = vmatmul.mubr.f32.gmra.mrb[42].mxu0 %v4462_v16  ;;  %v5894_v55 = vsel %vm5225_vm3, 4294967295, %v5893_v55  ;;  %vm5237_vm8 = vmpackc.low %vm5896_vm4, %vm5895_vm15  ;;  %v5897_v9 = vmov 0  ;;  %vm5901_vm11 = vcmp.eq.s32.totalorder %v4516_v0, %v4908_v19  ;;  %vm5904_vm15 = vcmp.eq.s32.totalorder %v4523_v43, %v4858_v60 }
 0x121   :  { %3558 = vmatpush3.bf16.msra.mxu0 %v4442_v49  ;;  %3235 = vmatprep.mubr.f32.mxu0 %v4474_v32  ;;  %v5898_v9 = vsel %vm5237_vm8, 4294967295, %v5897_v9  ;;  %vm5251_vm3 = vmpackc.low %vm5901_vm11, %vm5900_vm10  ;;  %v5902_v49 = vmov 0  ;;  %vm5905_vm4 = vcmp.eq.s32.totalorder %v4523_v43, %v4908_v19  ;;  %vm5908_vm13 = vcmp.eq.s32.totalorder %v4526_v5, %v4858_v60 }
 0x122   :  { %5899 = vst [vmem:[#allocation46_spill] sm:$0xff] %v5898_v9  ;;  %3560 = vmatprep.subr.bf16.mxu0 %v4477_v14  ;;  %v5903_v49 = vsel %vm5251_vm3, 4294967295, %v5902_v49  ;;  %vm5261_vm8 = vmpackc.low %vm5905_vm4, %vm5904_vm15  ;;  %v5906_v9 = vmov 0  ;;  %vm5909_vm10 = vcmp.eq.s32.totalorder %v4526_v5, %v4908_v19  ;;  %v5910_v0 = vmov 0 }
 0x123   :  { %v5907_v9 = vsel %vm5261_vm8, 4294967295, %v5906_v9  ;;  %vm5272_vm11 = vmpackc.low %vm5909_vm10, %vm5908_vm13  ;;  %vm1842_vm15 = vcmp.eq.s32.totalorder %v5243_v6, %v4520_v4  ;;  %vm1850_vm4 = vcmp.eq.s32.totalorder %v5243_v6, %v4518_v18  ;;  %vm1841_vm10 = vcmp.eq.s32.totalorder %v4034_v35, %v4520_v4 }
 0x124   :  { %3236 = vmatmul.mubr.f32.gmra.mrb[44].mxu0 %v4498_v27  ;;  %v5911_v0 = vsel %vm5272_vm11, 4294967295, %v5910_v0  ;;  %vm3591_vm13 = vmpackc.low %vm1850_vm4, %vm1842_vm15  ;;  %vm1849_vm11 = vcmp.eq.s32.totalorder %v4034_v35, %v4518_v18  ;;  %vm1858_vm8 = vcmp.eq.s32.totalorder %v5243_v6, %v4547_v21  ;;  %vm1866_vm3 = vcmp.eq.s32.totalorder %v5243_v6, %v4545_v37 }
 0x125   :  { %3562 = vmatpush3.bf16.msra.mxu0 %v4477_v14  ;;  %3238 = vmatprep.mubr.f32.mxu0 %v4510_v30  ;;  %v3754_v14 = vmov 1.0|1.0   ;;  %v3755_v43 = vmov 0.0|0.0   ;;  %vm3593_vm15 = vmpackc.low %vm1849_vm11, %vm1841_vm10  ;;  %vm1865_vm0 = vcmp.eq.s32.totalorder %v4034_v35, %v4545_v37  ;;  %vm1874_vm6 = vcmp.eq.s32.totalorder %v5243_v6, %v4588_v50 }
 0x126   :  { %3564 = vmatprep.subr.bf16.mxu0 %v4489_v53  ;;  %3399 = vmatprep.subr.bf16.mxu1 %v3755_v43  ;;  %vm3595_vm4 = vmpackc.low %vm1866_vm3, %vm1858_vm8  ;;  %vm1882_vm14 = vcmp.eq.s32.totalorder %v5243_v6, %v4586_v47  ;;  %vm1873_vm3 = vcmp.eq.s32.totalorder %v4034_v35, %v4588_v50  ;;  %vm1881_vm10 = vcmp.eq.s32.totalorder %v4034_v35, %v4586_v47 }
 0x127   :  { %vm3599_vm8 = vmpackc.low %vm1882_vm14, %vm1874_vm6  ;;  %vm1889_vm6 = vcmp.eq.s32.totalorder %v4034_v35, %v4638_v12 }
 0x128   :  { %3239 = vmatmul.mubr.f32.gmra.mrb[46].mxu0 %v4533_v3 }
 0x129   :  { %3566 = vmatpush3.bf16.msra.mxu0 %v4489_v53  ;;  %3308 = vmatprep.mubr.f32.mxu0 %v4568_v58 }
 0x12a   :  { %3592 = vmatprep.subr.msk.bf16.mxu0 %vm3591_vm13, %v3754_v14  ;;  %vm1857_vm13 = vcmp.eq.s32.totalorder %v4034_v35, %v4547_v21 }
 0x12b   :  { %vm3597_vm11 = vmpackc.low %vm1865_vm0, %vm1857_vm13  ;;  %vm1897_vm13 = vcmp.eq.s32.totalorder %v4034_v35, %v4636_v59 }
 0x12c   :  { %3309 = vmatmul.mubr.f32.vlgmr.msra.gmra.mrb[48].mxu0 %v4250_v28  ;;  %vm3601_vm0 = vmpackc.low %vm1881_vm10, %vm1873_vm3  ;;  %v3757_v28 = vmov 0.0  }
 0x12d   :  { %3594 = vmatpush1.bf16.msk.msra.mxu0 %vm3593_vm15, %v3754_v14  ;;  %3311 = vmatprep.mubr.f32.mxu0 %v4260_v20  ;;  %vm1890_vm15 = vcmp.eq.s32.totalorder %v5243_v6, %v4638_v12  ;;  %vm3605_vm3 = vmpackc.low %vm1897_vm13, %vm1889_vm6  ;;  %44 = vst [vmem:[#allocation2] sm:$0xff] %v3757_v28 }
 0x12e   :  { %3596 = vmatprep.subr.msk.bf16.mxu0 %vm3595_vm4, %v3754_v14  ;;  %vm1898_vm4 = vcmp.eq.s32.totalorder %v5243_v6, %v4636_v59 }
 0x12f   :  { %vm3603_vm14 = vmpackc.low %vm1898_vm4, %vm1890_vm15  ;;  %vm1905_vm15 = vcmp.eq.s32.totalorder %v4034_v35, %v4688_v38  ;;  %vm1913_vm4 = vcmp.eq.s32.totalorder %v4034_v35, %v4686_v48 }
 0x130   :  { %3312 = vmatmul.mubr.f32.gmra.mrb[50].mxu0 %v4283_v44  ;;  %vm3609_vm6 = vmpackc.low %vm1913_vm4, %vm1905_vm15  ;;  %vm1938_vm15 = vcmp.eq.s32.totalorder %v5243_v6, %v4786_v36 }
 0x131   :  { %3598 = vmatpush1.bf16.msk.msra.mxu0 %vm3597_vm11, %v3754_v14  ;;  %3314 = vmatprep.mubr.f32.mxu0 %v4297_v45  ;;  %vm1906_vm11 = vcmp.eq.s32.totalorder %v5243_v6, %v4688_v38 }
 0x132   :  { %3600 = vmatprep.subr.msk.bf16.mxu0 %vm3599_vm8, %v3754_v14  ;;  %vm1914_vm8 = vcmp.eq.s32.totalorder %v5243_v6, %v4686_v48 }
 0x133   :  { %vm3607_vm10 = vmpackc.low %vm1914_vm8, %vm1906_vm11  ;;  %vm1921_vm11 = vcmp.eq.s32.totalorder %v4034_v35, %v4738_v61  ;;  %vm1929_vm8 = vcmp.eq.s32.totalorder %v4034_v35, %v4736_v57 }
 0x134   :  { %3315 = vmatmul.mubr.f32.gmra.mrb[52].mxu0 %v4329_v33 }
 0x135   :  { %3602 = vmatpush1.bf16.msk.msra.mxu0 %vm3601_vm0, %v3754_v14  ;;  %3317 = vmatprep.mubr.f32.mxu0 %v4345_v1  ;;  %vm1922_vm0 = vcmp.eq.s32.totalorder %v5243_v6, %v4738_v61 }
 0x136   :  { %3604 = vmatprep.subr.msk.bf16.mxu0 %vm3603_vm14, %v3754_v14  ;;  %vm1930_vm14 = vcmp.eq.s32.totalorder %v5243_v6, %v4736_v57 }
 0x137   :  { %vm3611_vm13 = vmpackc.low %vm1930_vm14, %vm1922_vm0  ;;  %vm1945_vm0 = vcmp.eq.s32.totalorder %v4034_v35, %v4860_v46  ;;  %vm1962_vm14 = vcmp.eq.s32.totalorder %v5243_v6, %v4908_v19 }
 0x138   :  { %3318 = vmatmul.mubr.f32.gmra.mrb[54].mxu0 %v4372_v56 }
 0x139   :  { %3606 = vmatpush1.bf16.msk.msra.mxu0 %vm3605_vm3, %v3754_v14  ;;  %3320 = vmatprep.mubr.f32.mxu0 %v4385_v7  ;;  %vm1946_vm3 = vcmp.eq.s32.totalorder %v5243_v6, %v4860_v46 }
 0x13a   :  { %3608 = vmatprep.subr.msk.bf16.mxu0 %vm3607_vm10, %v3754_v14  ;;  %vm3613_vm10 = vmpackc.low %vm1929_vm8, %vm1921_vm11  ;;  %vm1954_vm11 = vcmp.eq.s32.totalorder %v5243_v6, %v4858_v60 }
 0x13b   :  { %vm3615_vm4 = vmpackc.low %vm1946_vm3, %vm1938_vm15  ;;  %vm1961_vm3 = vcmp.eq.s32.totalorder %v4034_v35, %v4908_v19  ;;  %vm1854_vm15 = vcmp.eq.s32.totalorder %v4559_v39, %v4518_v18 }
 0x13c   :  { %3321 = vmatmul.mubr.f32.gmra.mrb[56].mxu0 %v4415_v62  ;;  %vm3619_vm8 = vmpackc.low %vm1962_vm14, %vm1954_vm11 }
 0x13d   :  { %3610 = vmatpush1.bf16.msk.msra.mxu0 %vm3609_vm6, %v3754_v14  ;;  %3323 = vmatprep.mubr.f32.mxu0 %v4429_v52  ;;  %vm1937_vm6 = vcmp.eq.s32.totalorder %v4034_v35, %v4786_v36 }
 0x13e   :  { %3612 = vmatprep.subr.msk.bf16.mxu0 %vm3611_vm13, %v3754_v14  ;;  %vm3617_vm13 = vmpackc.low %vm1945_vm0, %vm1937_vm6  ;;  %vm3756_vm6 = vmmov 0  }
 0x13f   :  { %3091 = vmatprep.mubr.msk.f32.mxu1 %vm3756_vm6, %v3757_v28 }
 0x140   :  { %3324 = vmatmul.mubr.f32.gmra.mrb[58].mxu0 %v4462_v16 }
 0x141   :  { %3614 = vmatpush1.bf16.msk.msra.mxu0 %vm3613_vm10, %v3754_v14  ;;  %3326 = vmatprep.mubr.f32.mxu0 %v4474_v32  ;;  %vm1846_vm10 = vcmp.eq.s32.totalorder %v4559_v39, %v4520_v4 }
 0x142   :  { %3616 = vmatprep.subr.msk.bf16.mxu0 %vm3615_vm4, %v3754_v14  ;;  %vm1953_vm4 = vcmp.eq.s32.totalorder %v4034_v35, %v4858_v60  ;;  %vm3655_vm14 = vmpackc.low %vm1854_vm15, %vm1846_vm10 }
 0x143   :  { %vm3621_vm0 = vmpackc.low %vm1961_vm3, %vm1953_vm4 }
 0x144   :  { %3327 = vmatmul.mubr.f32.gmra.mrb[60].mxu0 %v4498_v27 }
 0x145   :  { %3618 = vmatpush1.bf16.msk.msra.mxu0 %vm3617_vm13, %v3754_v14  ;;  %3329 = vmatprep.mubr.f32.mxu0 %v4510_v30 }
 0x146   :  { %3620 = vmatprep.subr.msk.bf16.mxu0 %vm3619_vm8, %v3754_v14 }
 0x148   :  { %3330 = vmatmul.mubr.f32.gmra.mrb[62].mxu0 %v4533_v3 }
 0x149   :  { %3622 = vmatpush1.bf16.msk.msra.mxu0 %vm3621_vm0, %v3754_v14  ;;  %2298 = vmatprep.mubr.f32.mxu0 %v3757_v28 }
 0x14a   :  { %3656 = vmatprep.subr.msk.bf16.mxu0 %vm3655_vm14, %v3754_v14 }
 0x19f   :  { %v3037_v20 = vpop.f32.mrb[0].mxu0 }
 0x1a0   :  { %v510_v35 = vadd.f32 %v3037_v20, %v4211_v23  ;;  %v504_v44 = vpop.f32.mrb[1].mxu0 }
 0x1a1   :  { %v505_v45 = vadd.f32 %v504_v44, %v4213_v17 }
 0x1a2   :  { %v600_v33 = vmul.f32 0.1, %v510_v35  ;;  %vm584_vm13 = vcmp.gt.f32.partialorder %v510_v35, 0.0 }
 0x1a3   :  { %v599_v1 = vmul.f32 0.1, %v505_v45  ;;  %v3040_v56 = vpop.f32.mrb[2].mxu0  ;;  %vm583_vm11 = vcmp.gt.f32.partialorder %v505_v45, 0.0 }
 0x1a4   :  { %v520_v7 = vadd.f32 %v3040_v56, %v4232_v15  ;;  %v514_v62 = vpop.f32.mrb[3].mxu0  ;;  %v616_v52 = vsel %vm584_vm13, %v510_v35, %v600_v33 }
 0x1a5   :  { %v515_v16 = vadd.f32 %v514_v62, %v4234_v24  ;;  %v615_v32 = vsel %vm583_vm11, %v505_v45, %v599_v1 }
 0x1a6   :  { %vm586_vm8 = vcmp.gt.f32.partialorder %v520_v7, 0.0  ;;  %v602_v60 = vmul.f32 0.1, %v520_v7  ;;  %v3400_v46 = vpack.c.bf16 %v616_v52, %v615_v32 }
 0x1a7   :  { %vm585_vm3 = vcmp.gt.f32.partialorder %v515_v16, 0.0  ;;  %v601_v53 = vmul.f32 0.1, %v515_v16  ;;  %v3043_v27 = vpop.f32.mrb[4].mxu0 }
 0x1a8   :  { %v530_v30 = vadd.f32 %v3043_v27, %v4266_v34  ;;  %v524_v18 = vpop.f32.mrb[5].mxu0  ;;  %3401 = vmatpush3.bf16.msra.mxu1 %v3400_v46  ;;  %v618_v4 = vsel %vm586_vm8, %v520_v7, %v602_v60 }
 0x1a9   :  { %v525_v5 = vadd.f32 %v524_v18, %v4268_v42  ;;  %3402 = vmatprep.subr.bf16.mxu1 %v3755_v43  ;;  %v617_v3 = vsel %vm585_vm3, %v515_v16, %v601_v53 }
 0x1aa   :  { %vm588_vm10 = vcmp.gt.f32.partialorder %v530_v30, 0.0  ;;  %v604_v37 = vmul.f32 0.1, %v530_v30  ;;  %v3403_v21 = vpack.c.bf16 %v618_v4, %v617_v3 }
 0x1ab   :  { %vm587_vm15 = vcmp.gt.f32.partialorder %v525_v5, 0.0  ;;  %v603_v39 = vmul.f32 0.1, %v525_v5  ;;  %v3046_v61 = vpop.f32.mrb[6].mxu0 }
 0x1ac   :  { %v540_v58 = vadd.f32 %v3046_v61, %v4307_v51  ;;  %v534_v47 = vpop.f32.mrb[7].mxu0  ;;  %3404 = vmatpush3.bf16.msra.mxu1 %v3403_v21  ;;  %v620_v50 = vsel %vm588_vm10, %v530_v30, %v604_v37 }
 0x1ad   :  { %v535_v38 = vadd.f32 %v534_v47, %v4309_v41  ;;  %3405 = vmatprep.subr.bf16.mxu1 %v3755_v43  ;;  %v619_v12 = vsel %vm587_vm15, %v525_v5, %v603_v39  ;;  %v5912_v5 = vld [vmem:[#allocation8_spill] sm:$0xff]  ;;  %v5913_v47 = vld [vmem:[#allocation9_spill] sm:$0xff] }
 0x1ae   :  { %vm590_vm4 = vcmp.gt.f32.partialorder %v540_v58, 0.0  ;;  %v606_v59 = vmul.f32 0.1, %v540_v58  ;;  %v3406_v48 = vpack.c.bf16 %v620_v50, %v619_v12 }
 0x1af   :  { %vm589_vm0 = vcmp.gt.f32.partialorder %v535_v38, 0.0  ;;  %v605_v57 = vmul.f32 0.1, %v535_v38  ;;  %v3049_v36 = vpop.f32.mrb[8].mxu0 }
 0x1b0   :  { %v550_v19 = vadd.f32 %v3049_v36, %v4352_v22  ;;  %v544_v6 = vpop.f32.mrb[9].mxu0  ;;  %3407 = vmatpush3.bf16.msra.mxu1 %v3406_v48  ;;  %v622_v20 = vsel %vm590_vm4, %v540_v58, %v606_v59  ;;  %v5914_v59 = vld [vmem:[#allocation10_spill] sm:$0xff] }
 0x1b1   :  { %v545_v35 = vadd.f32 %v544_v6, %v4354_v31  ;;  %3408 = vmatprep.subr.bf16.mxu1 %v3755_v43  ;;  %v621_v44 = vsel %vm589_vm0, %v535_v38, %v605_v57 }
 0x1b2   :  { %vm592_vm14 = vcmp.gt.f32.partialorder %v550_v19, 0.0  ;;  %v608_v45 = vmul.f32 0.1, %v550_v19  ;;  %v3409_v33 = vpack.c.bf16 %v622_v20, %v621_v44 }
 0x1b3   :  { %vm591_vm13 = vcmp.gt.f32.partialorder %v545_v35, 0.0  ;;  %v607_v1 = vmul.f32 0.1, %v545_v35  ;;  %v3052_v56 = vpop.f32.mrb[10].mxu0 }
 0x1b4   :  { %v560_v7 = vadd.f32 %v3052_v56, %v4394_v26  ;;  %v554_v62 = vpop.f32.mrb[11].mxu0  ;;  %3410 = vmatpush3.bf16.msra.mxu1 %v3409_v33  ;;  %v624_v52 = vsel %vm592_vm14, %v550_v19, %v608_v45 }
 0x1b5   :  { %v555_v16 = vadd.f32 %v554_v62, %v4396_v29  ;;  %3411 = vmatprep.subr.bf16.mxu1 %v3755_v43  ;;  %v623_v32 = vsel %vm591_vm13, %v545_v35, %v607_v1 }
 0x1b6   :  { %vm594_vm11 = vcmp.gt.f32.partialorder %v560_v7, 0.0  ;;  %v610_v60 = vmul.f32 0.1, %v560_v7  ;;  %v3412_v46 = vpack.c.bf16 %v624_v52, %v623_v32 }
 0x1b7   :  { %vm593_vm8 = vcmp.gt.f32.partialorder %v555_v16, 0.0  ;;  %v609_v53 = vmul.f32 0.1, %v555_v16  ;;  %v3055_v27 = vpop.f32.mrb[12].mxu0 }
 0x1b8   :  { %v570_v30 = vadd.f32 %v3055_v27, %v4438_v63  ;;  %v564_v18 = vpop.f32.mrb[13].mxu0  ;;  %3413 = vmatpush3.bf16.msra.mxu1 %v3412_v46  ;;  %v626_v4 = vsel %vm594_vm11, %v560_v7, %v610_v60  ;;  %v5416_v46 = vld [vmem:[%s5664_s6] sm:$0x1] }
 0x1b9   :  { %v565_v3 = vadd.f32 %v564_v18, %v5912_v5  ;;  %3414 = vmatprep.subr.bf16.mxu1 %v3755_v43  ;;  %v625_v37 = vsel %vm593_vm8, %v555_v16, %v609_v53 }
 0x1ba   :  { %vm596_vm3 = vcmp.gt.f32.partialorder %v570_v30, 0.0  ;;  %v612_v21 = vmul.f32 0.1, %v570_v30  ;;  %v3415_v39 = vpack.c.bf16 %v626_v4, %v625_v37 }
 0x1bb   :  { %vm595_vm10 = vcmp.gt.f32.partialorder %v565_v3, 0.0  ;;  %v611_v61 = vmul.f32 0.1, %v565_v3  ;;  %v3058_v58 = vpop.f32.mrb[14].mxu0 }
 0x1bc   :  { %v580_v50 = vadd.f32 %v3058_v58, %v5913_v47  ;;  %v574_v38 = vpop.f32.mrb[15].mxu0  ;;  %3416 = vmatpush3.bf16.msra.mxu1 %v3415_v39  ;;  %v628_v12 = vsel %vm596_vm3, %v570_v30, %v612_v21 }
 0x1bd   :  { %v575_v48 = vadd.f32 %v574_v38, %v5914_v59  ;;  %3417 = vmatprep.subr.bf16.mxu1 %v3755_v43  ;;  %v627_v57 = vsel %vm595_vm10, %v565_v3, %v611_v61 }
 0x1be   :  { %vm598_vm15 = vcmp.gt.f32.partialorder %v580_v50, 0.0  ;;  %v614_v36 = vmul.f32 0.1, %v580_v50  ;;  %v3418_v19 = vpack.c.bf16 %v628_v12, %v627_v57 }
 0x1bf   :  { %vm597_vm4 = vcmp.gt.f32.partialorder %v575_v48, 0.0  ;;  %v613_v6 = vmul.f32 0.1, %v575_v48  ;;  %v3128_v20 = vpop.f32.mrb[16].mxu0 }
 0x1c0   :  { %v871_v35 = vadd.f32 %v3128_v20, %v4211_v23  ;;  %3419 = vmatpush3.bf16.msra.mxu1 %v3418_v19  ;;  %v865_v44 = vpop.f32.mrb[17].mxu0  ;;  %v630_v45 = vsel %vm598_vm15, %v580_v50, %v614_v36 }
 0x1c1   :  { %v866_v33 = vadd.f32 %v865_v44, %v4213_v17  ;;  %3420 = vmatprep.subr.bf16.mxu1 %v3755_v43  ;;  %v629_v1 = vsel %vm597_vm4, %v575_v48, %v613_v6 }
 0x1c2   :  { %vm945_vm0 = vcmp.gt.f32.partialorder %v871_v35, 0.0  ;;  %v961_v56 = vmul.f32 0.1, %v871_v35  ;;  %v3421_v7 = vpack.c.bf16 %v630_v45, %v629_v1 }
 0x1c3   :  { %vm944_vm14 = vcmp.gt.f32.partialorder %v866_v33, 0.0  ;;  %v960_v62 = vmul.f32 0.1, %v866_v33  ;;  %v3131_v52 = vpop.f32.mrb[18].mxu0 }
 0x1c4   :  { %v977_v16 = vsel %vm945_vm0, %v871_v35, %v961_v56  ;;  %v881_v32 = vadd.f32 %v3131_v52, %v4232_v15  ;;  %3422 = vmatpush3.bf16.msra.mxu1 %v3421_v7  ;;  %v875_v60 = vpop.f32.mrb[19].mxu0 }
 0x1c5   :  { %v976_v53 = vsel %vm944_vm14, %v866_v33, %v960_v62  ;;  %v876_v27 = vadd.f32 %v875_v60, %v4234_v24  ;;  %3455 = vmatprep.subr.bf16.mxu1 %v3755_v43 }
 0x1c6   :  { %v3456_v30 = vpack.c.bf16 %v977_v16, %v976_v53  ;;  %vm947_vm13 = vcmp.gt.f32.partialorder %v881_v32, 0.0  ;;  %v963_v18 = vmul.f32 0.1, %v881_v32 }
 0x1c7   :  { %vm946_vm11 = vcmp.gt.f32.partialorder %v876_v27, 0.0  ;;  %v962_v4 = vmul.f32 0.1, %v876_v27  ;;  %3092 = vmatmul.mubr.f32.vlgmr.msra.gmra.mrb[0].mxu1 %v5416_v46  ;;  %v3134_v3 = vpop.f32.mrb[20].mxu0 }
 0x1c8   :  { %v979_v37 = vsel %vm947_vm13, %v881_v32, %v963_v18  ;;  %v891_v21 = vadd.f32 %v3134_v3, %v4266_v34  ;;  %v885_v39 = vpop.f32.mrb[21].mxu0  ;;  %3457 = vmatpush3.bf16.msra.mxu1 %v3456_v30  ;;  %3182 = vmatprep.mubr.msk.f32.mxu1 %vm3756_vm6, %v3757_v28 }
 0x1c9   :  { %v978_v61 = vsel %vm946_vm11, %v876_v27, %v962_v4  ;;  %v886_v58 = vadd.f32 %v885_v39, %v4268_v42  ;;  %3458 = vmatprep.subr.bf16.mxu1 %v3755_v43 }
 0x1ca   :  { %v3459_v50 = vpack.c.bf16 %v979_v37, %v978_v61  ;;  %vm949_vm8 = vcmp.gt.f32.partialorder %v891_v21, 0.0  ;;  %v965_v38 = vmul.f32 0.1, %v891_v21 }
 0x1cb   :  { %vm948_vm3 = vcmp.gt.f32.partialorder %v886_v58, 0.0  ;;  %v964_v12 = vmul.f32 0.1, %v886_v58  ;;  %v3137_v48 = vpop.f32.mrb[22].mxu0 }
 0x1cc   :  { %v981_v57 = vsel %vm949_vm8, %v891_v21, %v965_v38  ;;  %v901_v36 = vadd.f32 %v3137_v48, %v4307_v51  ;;  %v895_v19 = vpop.f32.mrb[23].mxu0  ;;  %3460 = vmatpush3.bf16.msra.mxu1 %v3459_v50 }
 0x1cd   :  { %v980_v6 = vsel %vm948_vm3, %v886_v58, %v964_v12  ;;  %v896_v20 = vadd.f32 %v895_v19, %v4309_v41  ;;  %3461 = vmatprep.subr.bf16.mxu1 %v3755_v43 }
 0x1ce   :  { %v3462_v35 = vpack.c.bf16 %v981_v57, %v980_v6  ;;  %vm951_vm10 = vcmp.gt.f32.partialorder %v901_v36, 0.0  ;;  %v967_v44 = vmul.f32 0.1, %v901_v36 }
 0x1cf   :  { %vm950_vm15 = vcmp.gt.f32.partialorder %v896_v20, 0.0  ;;  %v966_v45 = vmul.f32 0.1, %v896_v20  ;;  %v3140_v33 = vpop.f32.mrb[24].mxu0 }
 0x1d0   :  { %v983_v1 = vsel %vm951_vm10, %v901_v36, %v967_v44  ;;  %v911_v56 = vadd.f32 %v3140_v33, %v4352_v22  ;;  %v905_v7 = vpop.f32.mrb[25].mxu0  ;;  %3463 = vmatpush3.bf16.msra.mxu1 %v3462_v35 }
 0x1d1   :  { %v982_v62 = vsel %vm950_vm15, %v896_v20, %v966_v45  ;;  %v906_v52 = vadd.f32 %v905_v7, %v4354_v31  ;;  %3464 = vmatprep.subr.bf16.mxu1 %v3755_v43 }
 0x1d2   :  { %v3465_v16 = vpack.c.bf16 %v983_v1, %v982_v62  ;;  %vm953_vm4 = vcmp.gt.f32.partialorder %v911_v56, 0.0  ;;  %v969_v32 = vmul.f32 0.1, %v911_v56 }
 0x1d3   :  { %vm952_vm0 = vcmp.gt.f32.partialorder %v906_v52, 0.0  ;;  %v968_v60 = vmul.f32 0.1, %v906_v52  ;;  %v3143_v53 = vpop.f32.mrb[26].mxu0 }
 0x1d4   :  { %v985_v27 = vsel %vm953_vm4, %v911_v56, %v969_v32  ;;  %v921_v30 = vadd.f32 %v3143_v53, %v4394_v26  ;;  %v915_v18 = vpop.f32.mrb[27].mxu0  ;;  %3466 = vmatpush3.bf16.msra.mxu1 %v3465_v16 }
 0x1d5   :  { %v984_v4 = vsel %vm952_vm0, %v906_v52, %v968_v60  ;;  %v916_v3 = vadd.f32 %v915_v18, %v4396_v29  ;;  %3467 = vmatprep.subr.bf16.mxu1 %v3755_v43 }
 0x1d6   :  { %v3468_v37 = vpack.c.bf16 %v985_v27, %v984_v4  ;;  %vm955_vm14 = vcmp.gt.f32.partialorder %v921_v30, 0.0  ;;  %v971_v21 = vmul.f32 0.1, %v921_v30 }
 0x1d7   :  { %vm954_vm13 = vcmp.gt.f32.partialorder %v916_v3, 0.0  ;;  %v970_v39 = vmul.f32 0.1, %v916_v3  ;;  %v3146_v61 = vpop.f32.mrb[28].mxu0 }
 0x1d8   :  { %v987_v58 = vsel %vm955_vm14, %v921_v30, %v971_v21  ;;  %v931_v50 = vadd.f32 %v3146_v61, %v4438_v63  ;;  %v925_v38 = vpop.f32.mrb[29].mxu0  ;;  %3469 = vmatpush3.bf16.msra.mxu1 %v3468_v37 }
 0x1d9   :  { %v986_v12 = vsel %vm954_vm13, %v916_v3, %v970_v39  ;;  %v926_v48 = vadd.f32 %v925_v38, %v5912_v5  ;;  %3470 = vmatprep.subr.bf16.mxu1 %v3755_v43 }
 0x1da   :  { %v3471_v57 = vpack.c.bf16 %v987_v58, %v986_v12  ;;  %vm957_vm11 = vcmp.gt.f32.partialorder %v931_v50, 0.0  ;;  %v973_v36 = vmul.f32 0.1, %v931_v50 }
 0x1db   :  { %vm956_vm8 = vcmp.gt.f32.partialorder %v926_v48, 0.0  ;;  %v972_v19 = vmul.f32 0.1, %v926_v48  ;;  %v3149_v6 = vpop.f32.mrb[30].mxu0 }
 0x1dc   :  { %v989_v20 = vsel %vm957_vm11, %v931_v50, %v973_v36  ;;  %v941_v35 = vadd.f32 %v3149_v6, %v5913_v47  ;;  %v935_v44 = vpop.f32.mrb[31].mxu0  ;;  %3472 = vmatpush3.bf16.msra.mxu1 %v3471_v57 }
 0x1dd   :  { %v988_v45 = vsel %vm956_vm8, %v926_v48, %v972_v19  ;;  %v936_v33 = vadd.f32 %v935_v44, %v5914_v59  ;;  %3473 = vmatprep.subr.bf16.mxu1 %v3755_v43 }
 0x1de   :  { %v3474_v1 = vpack.c.bf16 %v989_v20, %v988_v45  ;;  %vm959_vm3 = vcmp.gt.f32.partialorder %v941_v35, 0.0  ;;  %v975_v56 = vmul.f32 0.1, %v941_v35 }
 0x1df   :  { %vm958_vm10 = vcmp.gt.f32.partialorder %v936_v33, 0.0  ;;  %v974_v7 = vmul.f32 0.1, %v936_v33  ;;  %v3219_v62 = vpop.f32.mrb[32].mxu0 }
 0x1e0   :  { %v991_v52 = vsel %vm959_vm3, %v941_v35, %v975_v56  ;;  %v1223_v16 = vadd.f32 %v3219_v62, %v4211_v23  ;;  %3475 = vmatpush3.bf16.msra.mxu1 %v3474_v1  ;;  %v1217_v32 = vpop.f32.mrb[33].mxu0 }
 0x1e1   :  { %v990_v60 = vsel %vm958_vm10, %v936_v33, %v974_v7  ;;  %v1218_v53 = vadd.f32 %v1217_v32, %v4213_v17  ;;  %3476 = vmatprep.subr.bf16.mxu1 %v3755_v43 }
 0x1e2   :  { %v3477_v27 = vpack.c.bf16 %v991_v52, %v990_v60  ;;  %vm1297_vm15 = vcmp.gt.f32.partialorder %v1223_v16, 0.0  ;;  %v1313_v30 = vmul.f32 0.1, %v1223_v16 }
 0x1e3   :  { %vm1296_vm4 = vcmp.gt.f32.partialorder %v1218_v53, 0.0  ;;  %v1312_v18 = vmul.f32 0.1, %v1218_v53  ;;  %v3222_v4 = vpop.f32.mrb[34].mxu0 }
 0x1e4   :  { %v1329_v3 = vsel %vm1297_vm15, %v1223_v16, %v1313_v30  ;;  %v1233_v37 = vadd.f32 %v3222_v4, %v4232_v15  ;;  %3478 = vmatpush3.bf16.msra.mxu1 %v3477_v27  ;;  %v1227_v21 = vpop.f32.mrb[35].mxu0 }
 0x1e5   :  { %v1328_v39 = vsel %vm1296_vm4, %v1218_v53, %v1312_v18  ;;  %v1228_v61 = vadd.f32 %v1227_v21, %v4234_v24  ;;  %3511 = vmatprep.subr.bf16.mxu1 %v3755_v43 }
 0x1e6   :  { %v3512_v58 = vpack.c.bf16 %v1329_v3, %v1328_v39  ;;  %vm1299_vm0 = vcmp.gt.f32.partialorder %v1233_v37, 0.0  ;;  %v1315_v50 = vmul.f32 0.1, %v1233_v37 }
 0x1e7   :  { %vm1298_vm14 = vcmp.gt.f32.partialorder %v1228_v61, 0.0  ;;  %v1314_v38 = vmul.f32 0.1, %v1228_v61  ;;  %3183 = vmatmul.mubr.f32.vlgmr.msra.gmra.mrb[2].mxu1 %v5416_v46  ;;  %v3225_v12 = vpop.f32.mrb[36].mxu0 }
 0x1e8   :  { %v1331_v48 = vsel %vm1299_vm0, %v1233_v37, %v1315_v50  ;;  %v1243_v57 = vadd.f32 %v3225_v12, %v4266_v34  ;;  %v1237_v36 = vpop.f32.mrb[37].mxu0  ;;  %3513 = vmatpush3.bf16.msra.mxu1 %v3512_v58  ;;  %3273 = vmatprep.mubr.msk.f32.mxu1 %vm3756_vm6, %v3757_v28 }
 0x1e9   :  { %v1330_v19 = vsel %vm1298_vm14, %v1228_v61, %v1314_v38  ;;  %v1238_v6 = vadd.f32 %v1237_v36, %v4268_v42  ;;  %3514 = vmatprep.subr.bf16.mxu1 %v3755_v43 }
 0x1ea   :  { %v3515_v20 = vpack.c.bf16 %v1331_v48, %v1330_v19  ;;  %vm1301_vm13 = vcmp.gt.f32.partialorder %v1243_v57, 0.0  ;;  %v1317_v35 = vmul.f32 0.1, %v1243_v57 }
 0x1eb   :  { %vm1300_vm11 = vcmp.gt.f32.partialorder %v1238_v6, 0.0  ;;  %v1316_v44 = vmul.f32 0.1, %v1238_v6  ;;  %v3228_v45 = vpop.f32.mrb[38].mxu0 }
 0x1ec   :  { %v1333_v33 = vsel %vm1301_vm13, %v1243_v57, %v1317_v35  ;;  %v1253_v1 = vadd.f32 %v3228_v45, %v4307_v51  ;;  %v1247_v56 = vpop.f32.mrb[39].mxu0  ;;  %3516 = vmatpush3.bf16.msra.mxu1 %v3515_v20 }
 0x1ed   :  { %v1332_v7 = vsel %vm1300_vm11, %v1238_v6, %v1316_v44  ;;  %v1248_v62 = vadd.f32 %v1247_v56, %v4309_v41  ;;  %3517 = vmatprep.subr.bf16.mxu1 %v3755_v43 }
 0x1ee   :  { %v3518_v52 = vpack.c.bf16 %v1333_v33, %v1332_v7  ;;  %vm1303_vm8 = vcmp.gt.f32.partialorder %v1253_v1, 0.0  ;;  %v1319_v16 = vmul.f32 0.1, %v1253_v1 }
 0x1ef   :  { %vm1302_vm3 = vcmp.gt.f32.partialorder %v1248_v62, 0.0  ;;  %v1318_v32 = vmul.f32 0.1, %v1248_v62  ;;  %v3231_v60 = vpop.f32.mrb[40].mxu0 }
 0x1f0   :  { %v1335_v53 = vsel %vm1303_vm8, %v1253_v1, %v1319_v16  ;;  %v1263_v27 = vadd.f32 %v3231_v60, %v4352_v22  ;;  %v1257_v30 = vpop.f32.mrb[41].mxu0  ;;  %3519 = vmatpush3.bf16.msra.mxu1 %v3518_v52 }
 0x1f1   :  { %v1334_v18 = vsel %vm1302_vm3, %v1248_v62, %v1318_v32  ;;  %v1258_v4 = vadd.f32 %v1257_v30, %v4354_v31  ;;  %3520 = vmatprep.subr.bf16.mxu1 %v3755_v43 }
 0x1f2   :  { %v3521_v3 = vpack.c.bf16 %v1335_v53, %v1334_v18  ;;  %vm1305_vm10 = vcmp.gt.f32.partialorder %v1263_v27, 0.0  ;;  %v1321_v37 = vmul.f32 0.1, %v1263_v27 }
 0x1f3   :  { %vm1304_vm15 = vcmp.gt.f32.partialorder %v1258_v4, 0.0  ;;  %v1320_v21 = vmul.f32 0.1, %v1258_v4  ;;  %v3234_v39 = vpop.f32.mrb[42].mxu0 }
 0x1f4   :  { %v1337_v61 = vsel %vm1305_vm10, %v1263_v27, %v1321_v37  ;;  %v1273_v58 = vadd.f32 %v3234_v39, %v4394_v26  ;;  %v1267_v50 = vpop.f32.mrb[43].mxu0  ;;  %3522 = vmatpush3.bf16.msra.mxu1 %v3521_v3 }
 0x1f5   :  { %v1336_v38 = vsel %vm1304_vm15, %v1258_v4, %v1320_v21  ;;  %v1268_v12 = vadd.f32 %v1267_v50, %v4396_v29  ;;  %3523 = vmatprep.subr.bf16.mxu1 %v3755_v43 }
 0x1f6   :  { %v3524_v48 = vpack.c.bf16 %v1337_v61, %v1336_v38  ;;  %vm1307_vm4 = vcmp.gt.f32.partialorder %v1273_v58, 0.0  ;;  %v1323_v57 = vmul.f32 0.1, %v1273_v58 }
 0x1f7   :  { %vm1306_vm0 = vcmp.gt.f32.partialorder %v1268_v12, 0.0  ;;  %v1322_v36 = vmul.f32 0.1, %v1268_v12  ;;  %v3237_v19 = vpop.f32.mrb[44].mxu0 }
 0x1f8   :  { %v1339_v6 = vsel %vm1307_vm4, %v1273_v58, %v1323_v57  ;;  %v1283_v20 = vadd.f32 %v3237_v19, %v4438_v63  ;;  %v1277_v35 = vpop.f32.mrb[45].mxu0  ;;  %3525 = vmatpush3.bf16.msra.mxu1 %v3524_v48 }
 0x1f9   :  { %v1338_v44 = vsel %vm1306_vm0, %v1268_v12, %v1322_v36  ;;  %v1278_v45 = vadd.f32 %v1277_v35, %v5912_v5  ;;  %3526 = vmatprep.subr.bf16.mxu1 %v3755_v43 }
 0x1fa   :  { %v3527_v33 = vpack.c.bf16 %v1339_v6, %v1338_v44  ;;  %vm1309_vm14 = vcmp.gt.f32.partialorder %v1283_v20, 0.0  ;;  %v1325_v1 = vmul.f32 0.1, %v1283_v20 }
 0x1fb   :  { %vm1308_vm13 = vcmp.gt.f32.partialorder %v1278_v45, 0.0  ;;  %v1324_v56 = vmul.f32 0.1, %v1278_v45  ;;  %v3240_v7 = vpop.f32.mrb[46].mxu0 }
 0x1fc   :  { %v1341_v62 = vsel %vm1309_vm14, %v1283_v20, %v1325_v1  ;;  %v1293_v52 = vadd.f32 %v3240_v7, %v5913_v47  ;;  %v1287_v16 = vpop.f32.mrb[47].mxu0  ;;  %3528 = vmatpush3.bf16.msra.mxu1 %v3527_v33 }
 0x1fd   :  { %v1340_v32 = vsel %vm1308_vm13, %v1278_v45, %v1324_v56  ;;  %v1288_v60 = vadd.f32 %v1287_v16, %v5914_v59  ;;  %3529 = vmatprep.subr.bf16.mxu1 %v3755_v43 }
 0x1fe   :  { %v3530_v53 = vpack.c.bf16 %v1341_v62, %v1340_v32  ;;  %vm1311_vm11 = vcmp.gt.f32.partialorder %v1293_v52, 0.0  ;;  %v1327_v27 = vmul.f32 0.1, %v1293_v52 }
 0x1ff   :  { %vm1310_vm8 = vcmp.gt.f32.partialorder %v1288_v60, 0.0  ;;  %v1326_v30 = vmul.f32 0.1, %v1288_v60  ;;  %v3310_v18 = vpop.f32.mrb[48].mxu0 }
 0x200   :  { %v1343_v4 = vsel %vm1311_vm11, %v1293_v52, %v1327_v27  ;;  %v1575_v3 = vadd.f32 %v3310_v18, %v4211_v23  ;;  %3531 = vmatpush3.bf16.msra.mxu1 %v3530_v53  ;;  %v1569_v37 = vpop.f32.mrb[49].mxu0 }
 0x201   :  { %v1342_v21 = vsel %vm1310_vm8, %v1288_v60, %v1326_v30  ;;  %v1570_v39 = vadd.f32 %v1569_v37, %v4213_v17  ;;  %3532 = vmatprep.subr.bf16.mxu1 %v3755_v43 }
 0x202   :  { %v3533_v61 = vpack.c.bf16 %v1343_v4, %v1342_v21  ;;  %vm1649_vm3 = vcmp.gt.f32.partialorder %v1575_v3, 0.0  ;;  %v1665_v58 = vmul.f32 0.1, %v1575_v3 }
 0x203   :  { %vm1648_vm10 = vcmp.gt.f32.partialorder %v1570_v39, 0.0  ;;  %v1664_v50 = vmul.f32 0.1, %v1570_v39  ;;  %v3313_v38 = vpop.f32.mrb[50].mxu0 }
 0x204   :  { %v1681_v12 = vsel %vm1649_vm3, %v1575_v3, %v1665_v58  ;;  %v1585_v48 = vadd.f32 %v3313_v38, %v4232_v15  ;;  %3534 = vmatpush3.bf16.msra.mxu1 %v3533_v61  ;;  %v1579_v57 = vpop.f32.mrb[51].mxu0 }
 0x205   :  { %v1680_v36 = vsel %vm1648_vm10, %v1570_v39, %v1664_v50  ;;  %v1580_v23 = vadd.f32 %v1579_v57, %v4234_v24  ;;  %3567 = vmatprep.subr.bf16.mxu1 %v3755_v43 }
 0x206   :  { %v3568_v19 = vpack.c.bf16 %v1681_v12, %v1680_v36  ;;  %vm1651_vm15 = vcmp.gt.f32.partialorder %v1585_v48, 0.0  ;;  %v1667_v17 = vmul.f32 0.1, %v1585_v48 }
 0x207   :  { %vm1650_vm4 = vcmp.gt.f32.partialorder %v1580_v23, 0.0  ;;  %v1666_v6 = vmul.f32 0.1, %v1580_v23  ;;  %3274 = vmatmul.mubr.f32.vlgmr.msra.gmra.mrb[4].mxu1 %v5416_v46  ;;  %v3316_v20 = vpop.f32.mrb[52].mxu0 }
 0x208   :  { %v1683_v35 = vsel %vm1651_vm15, %v1585_v48, %v1667_v17  ;;  %v1595_v44 = vadd.f32 %v3316_v20, %v4266_v34  ;;  %v1589_v45 = vpop.f32.mrb[53].mxu0  ;;  %3569 = vmatpush3.bf16.msra.mxu1 %v3568_v19  ;;  %3364 = vmatprep.mubr.msk.f32.mxu1 %vm3756_vm6, %v3757_v28 }
 0x209   :  { %v1682_v15 = vsel %vm1650_vm4, %v1580_v23, %v1666_v6  ;;  %v1590_v24 = vadd.f32 %v1589_v45, %v4268_v42  ;;  %3570 = vmatprep.subr.bf16.mxu1 %v3755_v43 }
 0x20a   :  { %v3571_v33 = vpack.c.bf16 %v1683_v35, %v1682_v15  ;;  %vm1653_vm0 = vcmp.gt.f32.partialorder %v1595_v44, 0.0  ;;  %v1669_v1 = vmul.f32 0.1, %v1595_v44 }
 0x20b   :  { %vm1652_vm14 = vcmp.gt.f32.partialorder %v1590_v24, 0.0  ;;  %v1668_v56 = vmul.f32 0.1, %v1590_v24  ;;  %v3319_v7 = vpop.f32.mrb[54].mxu0 }
 0x20c   :  { %v1685_v62 = vsel %vm1653_vm0, %v1595_v44, %v1669_v1  ;;  %v1605_v52 = vadd.f32 %v3319_v7, %v4307_v51  ;;  %v1599_v34 = vpop.f32.mrb[55].mxu0  ;;  %3572 = vmatpush3.bf16.msra.mxu1 %v3571_v33 }
 0x20d   :  { %v1684_v16 = vsel %vm1652_vm14, %v1590_v24, %v1668_v56  ;;  %v1600_v32 = vadd.f32 %v1599_v34, %v4309_v41  ;;  %3573 = vmatprep.subr.bf16.mxu1 %v3755_v43 }
 0x20e   :  { %v3574_v60 = vpack.c.bf16 %v1685_v62, %v1684_v16  ;;  %vm1655_vm6 = vcmp.gt.f32.partialorder %v1605_v52, 0.0  ;;  %v1671_v42 = vmul.f32 0.1, %v1605_v52  ;;  %v5921_v16 = vld [vmem:[#allocation17_spill] sm:$0xff] }
 0x20f   :  { %vm1654_vm13 = vcmp.gt.f32.partialorder %v1600_v32, 0.0  ;;  %v1670_v53 = vmul.f32 0.1, %v1600_v32  ;;  %v3322_v27 = vpop.f32.mrb[56].mxu0 }
 0x210   :  { %v1687_v30 = vsel %vm1655_vm6, %v1605_v52, %v1671_v42  ;;  %v1615_v18 = vadd.f32 %v3322_v27, %v4352_v22  ;;  %v1609_v4 = vpop.f32.mrb[57].mxu0  ;;  %3575 = vmatpush3.bf16.msra.mxu1 %v3574_v60  ;;  %v5925_v60 = vld [vmem:[#allocation19_spill] sm:$0xff]  ;;  %v5927_v42 = vld [vmem:[#allocation21_spill] sm:$0xff]  ;;  %vm5933_vm6 = vnez %v5770_v10 }
 0x211   :  { %v1686_v3 = vsel %vm1654_vm13, %v1600_v32, %v1670_v53  ;;  %v1610_v51 = vadd.f32 %v1609_v4, %v4354_v31  ;;  %3576 = vmatprep.subr.bf16.mxu1 %v3755_v43  ;;  %v5923_v32 = vld [vmem:[#allocation18_spill] sm:$0xff]  ;;  %v5931_v27 = vld [vmem:[#allocation23_spill] sm:$0xff] }
 0x212   :  { %v3577_v37 = vpack.c.bf16 %v1687_v30, %v1686_v3  ;;  %vm1657_vm11 = vcmp.gt.f32.partialorder %v1615_v18, 0.0  ;;  %v1673_v41 = vmul.f32 0.1, %v1615_v18  ;;  %v5929_v53 = vld [vmem:[#allocation22_spill] sm:$0xff]  ;;  %v5934_v30 = vld [vmem:[#allocation27_spill] sm:$0xff]  ;;  %v5941_v3 = vld [vmem:[#allocation20_spill] sm:$0xff] }
 0x213   :  { %vm1656_vm8 = vcmp.gt.f32.partialorder %v1610_v51, 0.0  ;;  %v1672_v21 = vmul.f32 0.1, %v1610_v51  ;;  %v3325_v39 = vpop.f32.mrb[58].mxu0  ;;  %vm5935_vm13 = vnez %v5934_v30  ;;  %v5940_v4 = vld [vmem:[#allocation7_spill] sm:$0xff] }
 0x214   :  { %v1689_v61 = vsel %vm1657_vm11, %v1615_v18, %v1673_v41  ;;  %v1625_v58 = vadd.f32 %v3325_v39, %v4394_v26  ;;  %v1619_v50 = vpop.f32.mrb[59].mxu0  ;;  %3578 = vmatpush3.bf16.msra.mxu1 %v3577_v37  ;;  %vm5936_vm11 = vnez %v5777_v11  ;;  %v5938_v18 = vld [vmem:[#allocation24_spill] sm:$0xff]  ;;  %v639_v10 = vrot.slane %v5941_v3, %v5940_v4 }
 0x215   :  { %v1688_v38 = vsel %vm1656_vm8, %v1610_v51, %v1672_v21  ;;  %v1620_v22 = vadd.f32 %v1619_v50, %v4396_v29  ;;  %3579 = vmatprep.subr.bf16.mxu1 %v3755_v43  ;;  %vm5937_vm8 = vnez %v5780_v54  ;;  %v3728_v21 = vld [vmem:[%s5658_s0] sm:$0x1]  ;;  %s3758_s0 = smov [#allocation4]  }
 0x216   :  { %v3580_v12 = vpack.c.bf16 %v1689_v61, %v1688_v38  ;;  %vm1659_vm3 = vcmp.gt.f32.partialorder %v1625_v58, 0.0  ;;  %v1675_v31 = vmul.f32 0.1, %v1625_v58  ;;  %s2540_s21 = sshll.u32 %s3758_s0, 4  ;;  %s2541_s21 = int_to_ptr.vmem [resolvable:$true] %s2540_s21 }
 0x217   :  { %vm1658_vm10 = vcmp.gt.f32.partialorder %v1620_v22, 0.0  ;;  %v1674_v48 = vmul.f32 0.1, %v1620_v22  ;;  %v3328_v57 = vpop.f32.mrb[60].mxu0  ;;  %s3729_s22 = scalar_lea.vmem %s2541_s21, 1024  ;;  %p3734_p1 = scmp.lt.s32.totalorder %s2541_s21, %s2541_s21 }
 0x218   :  { %v1691_v36 = vsel %vm1659_vm3, %v1625_v58, %v1675_v31  ;;  %v1635_v23 = vadd.f32 %v3328_v57, %v4438_v63  ;;  %v1629_v19 = vpop.f32.mrb[61].mxu0  ;;  %3581 = vmatpush3.bf16.msra.mxu1 %v3580_v12  ;;  %vm5939_vm3 = vnez %v5938_v18  ;;  %p3730_p0 = scmp.ne.s32.totalorder %s2541_s21, %s3729_s22  ;;  %p3735_p2 = scmp.lt.s32.totalorder %s3729_s22, %s3729_s22 }
 0x219   :  { %v1690_v17 = vsel %vm1658_vm10, %v1620_v22, %v1674_v48  ;;  %v1630_v26 = vadd.f32 %v1629_v19, %v5912_v5  ;;  %3582 = vmatprep.subr.bf16.mxu1 %v3755_v43  ;;  %v5942_v19 = vld [vmem:[#allocation25_spill] sm:$0xff] }
 0x21a   :  { %v3583_v6 = vpack.c.bf16 %v1691_v36, %v1690_v17  ;;  %vm1661_vm15 = vcmp.gt.f32.partialorder %v1635_v23, 0.0  ;;  %v1677_v29 = vmul.f32 0.1, %v1635_v23  ;;  %vm5943_vm10 = vnez %v5942_v19  ;;  %v5944_v17 = vld [vmem:[#allocation26_spill] sm:$0xff]  ;;  %p3736_p3 = por %p3735_p2, %p3734_p1 }
 0x21b   :  { %vm1660_vm4 = vcmp.gt.f32.partialorder %v1630_v26, 0.0  ;;  %v1676_v20 = vmul.f32 0.1, %v1630_v26  ;;  %v3331_v35 = vpop.f32.mrb[62].mxu0 }
 0x21c   :  { %v1693_v44 = vsel %vm1661_vm15, %v1635_v23, %v1677_v29  ;;  %v1645_v45 = vadd.f32 %v3331_v35, %v5913_v47  ;;  %v1639_v15 = vpop.f32.mrb[63].mxu0  ;;  %3584 = vmatpush3.bf16.msra.mxu1 %v3583_v6  ;;  %vm5945_vm15 = vnez %v5944_v17  ;;  %v5949_v6 = vld [vmem:[#allocation29_spill] sm:$0xff]  ;;  %v5952_v29 = vld [vmem:[#allocation30_spill] sm:$0xff]  ;;  %v5963_v35 = vld [vmem:[#allocation35_spill] sm:$0xff]  ;;  %p3737_p4 = pnand %p3736_p3, %p3730_p0 }
 0x21d   :  { %v1692_v24 = vsel %vm1660_vm4, %v1630_v26, %v1676_v20  ;;  %v1640_v63 = vadd.f32 %v1639_v15, %v5914_v59  ;;  %3585 = vmatprep.subr.bf16.mxu1 %v3755_v43  ;;  %vm5946_vm4 = vnez %v5784_v40  ;;  %v5947_v26 = vld [vmem:[#allocation28_spill] sm:$0xff]  ;;  %v5954_v40 = vld [vmem:[#allocation31_spill] sm:$0xff] }
 0x21e   :  { %v3586_v33 = vpack.c.bf16 %v1693_v44, %v1692_v24  ;;  %vm1663_vm0 = vcmp.gt.f32.partialorder %v1645_v45, 0.0  ;;  %v1679_v5 = vmul.f32 0.1, %v1645_v45  ;;  %v5956_v20 = vld [vmem:[#allocation32_spill] sm:$0xff]  ;;  %v5973_v15 = vld [vmem:[#allocation39_spill] sm:$0xff]  ;;  %v5977_v24 = vld [vmem:[#allocation41_spill] sm:$0xff] }
 0x21f   :  { %vm1662_vm14 = vcmp.gt.f32.partialorder %v1640_v63, 0.0  ;;  %v1678_v1 = vmul.f32 0.1, %v1640_v63  ;;  %v5966_v44 = vld [vmem:[#allocation36_spill] sm:$0xff] }
 0x220   :  { %v1695_v56 = vsel %vm1663_vm0, %v1645_v45, %v1679_v5  ;;  %3587 = vmatpush3.bf16.msra.mxu1 %v3586_v33  ;;  %vm5948_vm0 = vnez %v5947_v26  ;;  %v5970_v45 = vld [vmem:[#allocation38_spill] sm:$0xff]  ;;  %v5981_v33 = vld [vmem:[#allocation43_spill] sm:$0xff]  ;;  %v5985_v5 = vld [vmem:[#allocation45_spill] sm:$0xff] }
 0x221   :  { %v1694_v7 = vsel %vm1662_vm14, %v1640_v63, %v1678_v1  ;;  %3588 = vmatprep.subr.bf16.mxu1 %v3755_v43  ;;  %vm5950_vm14 = vnez %v5949_v6  ;;  %v5979_v63 = vld [vmem:[#allocation42_spill] sm:$0xff] }
 0x222   :  { %v3589_v62 = vpack.c.bf16 %v1695_v56, %v1694_v7  ;;  %v5988_v1 = vld [vmem:[#allocation46_spill] sm:$0xff] }
 0x224   :  { %3590 = vmatpush3.bf16.msra.mxu1 %v3589_v62 }
 0x225   :  { %3624 = vmatprep.subr.msk.bf16.mxu1 %vm4561_vm9, %v3754_v14  ;;  %vm5922_vm9 = vnez %v5921_v16 }
 0x227   :  { %3365 = vmatmul.mubr.f32.vlgmr.msra.gmra.mrb[6].mxu1 %v5416_v46 }
 0x228   :  { %3626 = vmatpush1.bf16.msk.msra.mxu1 %vm4596_vm1, %v3754_v14  ;;  %2369 = vmatprep.mubr.f32.mxu1 %v3757_v28  ;;  %vm5924_vm1 = vnez %v5923_v32 }
 0x229   :  { %3628 = vmatprep.subr.msk.bf16.mxu1 %vm4615_vm2, %v3754_v14  ;;  %vm5926_vm2 = vnez %v5925_v60 }
 0x22c   :  { %3630 = vmatpush1.bf16.msk.msra.mxu1 %vm4646_vm7, %v3754_v14  ;;  %vm5928_vm7 = vnez %v5927_v42 }
 0x22d   :  { %3632 = vmatprep.subr.msk.bf16.mxu1 %vm4665_vm12, %v3754_v14  ;;  %vm5930_vm12 = vnez %v5929_v53 }
 0x230   :  { %3634 = vmatpush1.bf16.msk.msra.mxu1 %vm4696_vm5, %v3754_v14  ;;  %vm5932_vm5 = vnez %v5931_v27 }
 0x231   :  { %3636 = vmatprep.subr.msk.bf16.mxu1 %vm5922_vm9, %v3754_v14  ;;  %vm5951_vm9 = vnez %v5798_v2  ;;  %v5961_v2 = vld [vmem:[#allocation34_spill] sm:$0xff] }
 0x234   :  { %3638 = vmatpush1.bf16.msk.msra.mxu1 %vm5924_vm1, %v3754_v14  ;;  %vm5953_vm1 = vnez %v5952_v29 }
 0x235   :  { %3640 = vmatprep.subr.msk.bf16.mxu1 %vm5926_vm2, %v3754_v14  ;;  %vm5955_vm2 = vnez %v5954_v40 }
 0x238   :  { %3642 = vmatpush1.bf16.msk.msra.mxu1 %vm5928_vm7, %v3754_v14  ;;  %vm5957_vm7 = vnez %v5956_v20 }
 0x239   :  { %3644 = vmatprep.subr.msk.bf16.mxu1 %vm5930_vm12, %v3754_v14  ;;  %vm5958_vm12 = vnez %v5817_v13  ;;  %v5968_v13 = vld [vmem:[#allocation37_spill] sm:$0xff] }
 0x23c   :  { %3646 = vmatpush1.bf16.msk.msra.mxu1 %vm5932_vm5, %v3754_v14 }
 0x23d   :  { %3648 = vmatprep.subr.msk.bf16.mxu1 %vm5933_vm6, %v3754_v14  ;;  %vm5962_vm6 = vnez %v5961_v2 }
 0x240   :  { %3650 = vmatpush1.bf16.msk.msra.mxu1 %vm5935_vm13, %v3754_v14  ;;  %vm5964_vm13 = vnez %v5963_v35 }
 0x241   :  { %3652 = vmatprep.subr.msk.bf16.mxu1 %vm5936_vm11, %v3754_v14  ;;  %vm5965_vm11 = vnez %v5836_v25  ;;  %v5975_v25 = vld [vmem:[#allocation40_spill] sm:$0xff] }
 0x244   :  { %3654 = vmatpush1.bf16.msk.msra.mxu1 %vm5937_vm8, %v3754_v14  ;;  %vm5967_vm8 = vnez %v5966_v44 }
 0x245   :  { %3688 = vmatprep.subr.msk.bf16.mxu1 %vm5939_vm3, %v3754_v14  ;;  %vm5969_vm3 = vnez %v5968_v13 }
 0x29a   :  { %v706_v51 = vpop.f32.mrb[0].mxu1 }
 0x29b   :  { %v707_v37 = vadd.f32 %v706_v51, %v639_v10  ;;  %v3093_v41 = vpop.f32.mrb[1].mxu1 }
 0x29d   :  { %v710_v11 = vmul.f32 %v3728_v21, %v707_v37 }
 0x29f   :  { %711 = vst [vmem:[#allocation2] sm:$0x1] %v710_v11 }
 0x2ba   :  { %v1058_v39 = vpop.f32.mrb[2].mxu1 }
 0x2bb   :  { %v1059_v61 = vadd.f32 %v1058_v39, %v639_v10  ;;  %v3184_v54 = vpop.f32.mrb[3].mxu1 }
 0x2bd   :  { %v1062_v58 = vmul.f32 %v3728_v21, %v1059_v61 }
 0x2bf   :  { %1063 = vst [vmem:[#allocation2 + $0x1] sm:$0x1] %v1062_v58 }
 0x2da   :  { %v1410_v50 = vpop.f32.mrb[4].mxu1 }
 0x2db   :  { %v1411_v38 = vadd.f32 %v1410_v50, %v639_v10  ;;  %v3275_v22 = vpop.f32.mrb[5].mxu1 }
 0x2dd   :  { %v1414_v12 = vmul.f32 %v3728_v21, %v1411_v38 }
 0x2df   :  { %1415 = vst [vmem:[#allocation2 + $0x2] sm:$0x1] %v1414_v12 }
 0x2fa   :  { %v1762_v31 = vpop.f32.mrb[6].mxu1 }
 0x2fb   :  { %v1763_v48 = vadd.f32 %v1762_v31, %v639_v10  ;;  %v3366_v57 = vpop.f32.mrb[7].mxu1 }
 0x2fd   :  { %v1766_v36 = vmul.f32 %v3728_v21, %v1763_v48 }
 0x2ff   :  { %1767 = vst [vmem:[#allocation2 + $0x3] sm:$0x1] %v1766_v36 }
 0x306   :  { %v2233_v23 = vld [vmem:[#allocation2] sm:$0xff] }
 0x307   :  { %2299 = vmatmul.mubr.f32.vlgmr.msra.gmra.mrb[64].mxu0 %v2233_v23  ;;  %2370 = vmatmul.mubr.f32.vlgmr.msra.gmra.mrb[8].mxu1 %v2233_v23 }
 0x308   :  { %3658 = vmatpush1.bf16.msk.msra.mxu0 %vm5943_vm10, %v3754_v14  ;;  %3690 = vmatpush1.bf16.msk.msra.mxu1 %vm5945_vm15, %v3754_v14  ;;  %vm5971_vm10 = vnez %v5970_v45  ;;  %vm5972_vm15 = vnez %v5855_v8  ;;  %v5983_v8 = vld [vmem:[#allocation44_spill] sm:$0xff] }
 0x309   :  { %3660 = vmatprep.subr.msk.bf16.mxu0 %vm5946_vm4, %v3754_v14  ;;  %3692 = vmatprep.subr.msk.bf16.mxu1 %vm5948_vm0, %v3754_v14  ;;  %vm5974_vm4 = vnez %v5973_v15  ;;  %vm5976_vm0 = vnez %v5975_v25 }
 0x30a   :  { %2440 = vmatprep.mubr.f32.mxu0 %v3757_v28  ;;  %2511 = vmatprep.mubr.f32.mxu1 %v3757_v28  ;;  %v5959_v28 = vld [vmem:[#allocation33_spill] sm:$0xff] }
 0x30b   :  { %vm5960_vm5 = vnez %v5959_v28 }
 0x30c   :  { %3662 = vmatpush1.bf16.msk.msra.mxu0 %vm5950_vm14, %v3754_v14  ;;  %3694 = vmatpush1.bf16.msk.msra.mxu1 %vm5951_vm9, %v3754_v14  ;;  %vm5978_vm14 = vnez %v5977_v24  ;;  %vm5980_vm9 = vnez %v5979_v63 }
 0x30d   :  { %3664 = vmatprep.subr.msk.bf16.mxu0 %vm5953_vm1, %v3754_v14  ;;  %3696 = vmatprep.subr.msk.bf16.mxu1 %vm5955_vm2, %v3754_v14  ;;  %vm5982_vm1 = vnez %v5981_v33  ;;  %vm5984_vm2 = vnez %v5983_v8 }
 0x310   :  { %3666 = vmatpush1.bf16.msk.msra.mxu0 %vm5957_vm7, %v3754_v14  ;;  %3698 = vmatpush1.bf16.msk.msra.mxu1 %vm5958_vm12, %v3754_v14  ;;  %vm5986_vm7 = vnez %v5985_v5  ;;  %vm5987_vm12 = vnez %v5894_v55 }
 0x311   :  { %3668 = vmatprep.subr.msk.bf16.mxu0 %vm5960_vm5, %v3754_v14  ;;  %3700 = vmatprep.subr.msk.bf16.mxu1 %vm5962_vm6, %v3754_v14  ;;  %vm5989_vm5 = vnez %v5988_v1  ;;  %vm5990_vm6 = vnez %v5903_v49 }
 0x314   :  { %3670 = vmatpush1.bf16.msk.msra.mxu0 %vm5964_vm13, %v3754_v14  ;;  %3702 = vmatpush1.bf16.msk.msra.mxu1 %vm5965_vm11, %v3754_v14  ;;  %vm5991_vm13 = vnez %v5907_v9  ;;  %vm5992_vm11 = vnez %v5911_v0 }
 0x315   :  { %3672 = vmatprep.subr.msk.bf16.mxu0 %vm5967_vm8, %v3754_v14  ;;  %3704 = vmatprep.subr.msk.bf16.mxu1 %vm5969_vm3, %v3754_v14 }
 0x318   :  { %3674 = vmatpush1.bf16.msk.msra.mxu0 %vm5971_vm10, %v3754_v14  ;;  %3706 = vmatpush1.bf16.msk.msra.mxu1 %vm5972_vm15, %v3754_v14 }
 0x319   :  { %3676 = vmatprep.subr.msk.bf16.mxu0 %vm5974_vm4, %v3754_v14  ;;  %3708 = vmatprep.subr.msk.bf16.mxu1 %vm5976_vm0, %v3754_v14 }
 0x31c   :  { %3678 = vmatpush1.bf16.msk.msra.mxu0 %vm5978_vm14, %v3754_v14  ;;  %3710 = vmatpush1.bf16.msk.msra.mxu1 %vm5980_vm9, %v3754_v14 }
 0x31d   :  { %3680 = vmatprep.subr.msk.bf16.mxu0 %vm5982_vm1, %v3754_v14  ;;  %3712 = vmatprep.subr.msk.bf16.mxu1 %vm5984_vm2, %v3754_v14 }
 0x320   :  { %3682 = vmatpush1.bf16.msk.msra.mxu0 %vm5986_vm7, %v3754_v14  ;;  %3714 = vmatpush1.bf16.msk.msra.mxu1 %vm5987_vm12, %v3754_v14 }
 0x321   :  { %3684 = vmatprep.subr.msk.bf16.mxu0 %vm5989_vm5, %v3754_v14  ;;  %3716 = vmatprep.subr.msk.bf16.mxu1 %vm5990_vm6, %v3754_v14 }
 0x324   :  { %3686 = vmatpush1.bf16.msk.msra.mxu0 %vm5991_vm13, %v3754_v14  ;;  %3718 = vmatpush1.bf16.msk.msra.mxu1 %vm5992_vm11, %v3754_v14 }
 0x327   :  { %2441 = vmatmul.mubr.f32.vlgmr.msra.gmra.mrb[66].mxu0 %v2233_v23  ;;  %2512 = vmatmul.mubr.f32.vlgmr.msra.gmra.mrb[10].mxu1 %v2233_v23 }
 0x3da   :  { %v2300_v55 = vpop.f32.mrb[64].mxu0  ;;  %v2371_v56 = vpop.f32.mrb[8].mxu1 }
 0x3db   :  { %v2302_v7 = vpop.f32.mrb[65].mxu0  ;;  %v2373_v62 = vpop.f32.mrb[9].mxu1  ;;  %2526 = vst [vmem:[#allocation4] sm:$0xff] %v2300_v55  ;;  %2528 = vst [vmem:[#allocation4 + $0x10] sm:$0xff] %v2371_v56 }
 0x3dc   :  { %2527 = vst [vmem:[#allocation4 + $0x8] sm:$0xff] %v2302_v7  ;;  %2529 = vst [vmem:[#allocation4 + $0x18] sm:$0xff] %v2373_v62 }
 0x3fa   :  { %v2442_v49 = vpop.f32.mrb[66].mxu0  ;;  %v2513_v47 = vpop.f32.mrb[10].mxu1 }
 0x3fb   :  { %v2444_v9 = vpop.f32.mrb[67].mxu0  ;;  %v2515_v59 = vpop.f32.mrb[11].mxu1  ;;  %2530 = vst [vmem:[#allocation4 + $0x20] sm:$0xff] %v2442_v49  ;;  %2532 = vst [vmem:[#allocation4 + $0x30] sm:$0xff] %v2513_v47 }
 0x3fc   :  { %2531 = vst [vmem:[#allocation4 + $0x28] sm:$0xff] %v2444_v9  ;;  %2533 = vst [vmem:[#allocation4 + $0x38] sm:$0xff] %v2515_v59 }
 0x3fd   :  { %3740 = shalt.err (!%p3737_p4)
}
 0x3fe   :  { %s3741_s25 = scalar_lea.hbm %s5666_s8, 1024 }
 0x3ff   :  { %p3742_p5 = scmp.ne.s32.totalorder %s5666_s8, %s3741_s25  ;;  %p3745_p6 = scmp.lt.u32.totalorder %s3741_s25, %s5666_s8 }
 0x401   :  { %p3747_p7 = pnand %p3745_p6, %p3742_p5 }
 0x403   :  { %3750 = shalt.err (!%p3747_p7)
}
 0x404   :  { %2543 = dma.vmem_to_hbm [thread:$0]  %s2541_s21, 1024, %s5666_s8, [#allocation5]  }
 0x405   :  { %3751 = dma.done.wait [#allocation5], 1024  }
 0x406   :  { %3752 = vsyncadd [#allocation5], 4294966272 }
 0x407   :  { %2547 = vsyncpa [#allocation5], 1 }

</bundles_post_ra>
